<compile_context>
chip_gen: v6e
topology: v6e:2x2x1
jax: 0.10.0
libtpu: 0.0.40
codegen_flags: <defaults>
</compile_context>

<pallas_src>
import functools

import jax
import jax.numpy as jnp
from jax import lax
from jax.experimental import pallas as pl
from jax.experimental.pallas import tpu as pltpu

LANE = 128

# Packed-parameter row layout (gate order i, f, g, o as in PyTorch):
#   rows 0:4   -> w_ih
#   rows 4:8   -> w_hh
#   rows 8:12  -> b  (= b_ih + b_hh)
#   row  12    -> h0
#   row  13    -> c0
#   rows 14:16 -> zero padding (sublane alignment to 16)


def _sigmoid_via_tanh(z):
    # sigmoid(z) == 0.5 * tanh(0.5 * z) + 0.5  -> single EUP push per gate
    return 0.5 * jnp.tanh(0.5 * z) + 0.5


def _lstm_univariate_kernel(x_ref, p_ref, out_ref,
                            pi_ref, pf_ref, pg_ref, po_ref):
    # Parameter slices, each (1, tile_F)
    w_ii = p_ref[0:1, :]
    w_if = p_ref[1:2, :]
    w_ig = p_ref[2:3, :]
    w_io = p_ref[3:4, :]
    u_i = p_ref[4:5, :]
    u_f = p_ref[5:6, :]
    u_g = p_ref[6:7, :]
    u_o = p_ref[7:8, :]
    b_i = p_ref[8:9, :]
    b_f = p_ref[9:10, :]
    b_g = p_ref[10:11, :]
    b_o = p_ref[11:12, :]
    h0 = p_ref[12:13, :]
    c0 = p_ref[13:14, :]

    # Hoisted x-dependent pre-activations: dense (T, tile_F) full-vreg VPU work
    # done once, outside the serial recurrence.
    x = x_ref[...]
    pi_ref[...] = x * w_ii + b_i
    pf_ref[...] = x * w_if + b_f
    pg_ref[...] = x * w_ig + b_g
    po_ref[...] = x * w_io + b_o

    T = x_ref.shape[0]

    def step(t, carry):
        h, c = carry                                        # each (1, tile_F)
        i = _sigmoid_via_tanh(pi_ref[pl.ds(t, 1), :] + u_i * h)
        f = _sigmoid_via_tanh(pf_ref[pl.ds(t, 1), :] + u_f * h)
        g = jnp.tanh(pg_ref[pl.ds(t, 1), :] + u_g * h)
        o = _sigmoid_via_tanh(po_ref[pl.ds(t, 1), :] + u_o * h)
        c_new = f * c + i * g
        h_new = o * jnp.tanh(c_new)
        out_ref[pl.ds(t, 1), :] = 2.0 * h_new               # lane-dense store
        return (h_new, c_new)

    # Unroll so the LLO scheduler can overlap the independent gate EUP pushes.
    unroll = True if T <= 32 else 8
    lax.fori_loop(0, T, step, (h0, c0), unroll=unroll)


def lstm_univariate_forward(x, w_ih, w_hh, b, h0, c0, *, tile_f=512):
    """x: (T, F); w_ih, w_hh, b: (4, F); h0, c0: (1, F).  Returns (T, F)."""
    T, F = x.shape
    dtype = x.dtype

    # Lane-dense feature padding + tile sizing (feature tiles are independent).
    f128 = ((F + LANE - 1) // LANE) * LANE
    tile_f = min(max(tile_f, LANE), f128)
    tile_f = ((tile_f + LANE - 1) // LANE) * LANE
    f_pad = ((f128 + tile_f - 1) // tile_f) * tile_f
    pad = f_pad - F

    xp = jnp.pad(x, ((0, 0), (0, pad)))

    # Single packed parameter array (16, F_pad): one DMA instead of six.
    params = jnp.concatenate(
        [w_ih, w_hh, b, h0, c0, jnp.zeros((2, F), dtype)], axis=0)
    params = jnp.pad(params, ((0, 0), (0, pad)))

    grid = (f_pad // tile_f,)

    out = pl.pallas_call(
        _lstm_univariate_kernel,
        out_shape=jax.ShapeDtypeStruct((T, f_pad), dtype),
        grid_spec=pltpu.PrefetchScalarGridSpec(
            num_scalar_prefetch=0,
            grid=grid,
            in_specs=[
                pl.BlockSpec((T, tile_f), lambda j: (0, j)),   # x
                pl.BlockSpec((16, tile_f), lambda j: (0, j)),  # packed params
            ],
            out_specs=pl.BlockSpec((T, tile_f), lambda j: (0, j)),
            scratch_shapes=[pltpu.VMEM((T, tile_f), jnp.float32)] * 4,
        ),
        compiler_params=pltpu.CompilerParams(
            dimension_semantics=("parallel",)),
    )(xp, params)

    return out[:, :F]


def _reference_forward(x, w_ih, w_hh, b, h0, c0):
    """Pure-JAX reference (lax.scan) for correctness checking."""
    def step(carry, xt):
        h, c = carry
        xt = xt[None, :]
        i = jax.nn.sigmoid(w_ih[0:1] * xt + w_hh[0:1] * h + b[0:1])
        f = jax.nn.sigmoid(w_ih[1:2] * xt + w_hh[1:2] * h + b[1:2])
        g = jnp.tanh(w_ih[2:3] * xt + w_hh[2:3] * h + b[2:3])
        o = jax.nn.sigmoid(w_ih[3:4] * xt + w_hh[3:4] * h + b[3:4])
        c_new = f * c + i * g
        h_new = o * jnp.tanh(c_new)
        return (h_new, c_new), (2.0 * h_new)[0]

    _, ys = lax.scan(step, (h0, c0), x)
    return ys


if __name__ == "__main__":
    feats = 8     # n_feats
    T = 16        # sequence length (leading axis of x)
    # NOTE: at this toy size wall time is dominated by launch + DMA overhead;
    # the kernel is structured so larger (T, F) problems scale (feature-tiled
    # parallel grid, lane-dense stores, hoisted pre-activations).

    key = jax.random.PRNGKey(0)
    kx, kwih, kwhh, kbih, kbhh, kh, kc = jax.random.split(key, 7)

    # Input: (T, feats) float32
    x = jax.random.normal(kx, (T, feats), dtype=jnp.float32)

    # nn.LSTM(1, 1) parameters per feature, gate order (i, f, g, o),
    # PyTorch init: U(-1/sqrt(hidden), 1/sqrt(hidden)) = U(-1, 1) for hidden=1.
    w_ih = jax.random.uniform(kwih, (4, feats), jnp.float32, -1.0, 1.0)
    w_hh = jax.random.uniform(kwhh, (4, feats), jnp.float32, -1.0, 1.0)
    b_ih = jax.random.uniform(kbih, (4, feats), jnp.float32, -1.0, 1.0)
    b_hh = jax.random.uniform(kbhh, (4, feats), jnp.float32, -1.0, 1.0)
    b = b_ih + b_hh

    # Initial hidden/cell states (deterministic stand-in for torch.rand/randn).
    h0 = jax.random.uniform(kh, (1, feats), jnp.float32)   # torch.rand
    c0 = jax.random.normal(kc, (1, feats), jnp.float32)    # torch.randn

    out = lstm_univariate_forward(x, w_ih, w_hh, b, h0, c0)
    out = jax.block_until_ready(out)

    ref = _reference_forward(x, w_ih, w_hh, b, h0, c0)
    assert out.shape == (T, feats)
    assert jnp.allclose(out, ref, atol=1e-5, rtol=1e-5), "mismatch vs reference"

    print("KERNEL_OK")
</pallas_src>

<mosaic_0001>
module attributes {stable_mosaic.version = 11 : i64} {
  func.func @_lstm_univariate_kernel(%arg0: i32, %arg1: memref<16x128xf32, #tpu.memory_space<vmem>>, %arg2: memref<16x128xf32, #tpu.memory_space<vmem>>, %arg3: memref<16x128xf32, #tpu.memory_space<vmem>>, %arg4: memref<16x128xf32, #tpu.memory_space<vmem>>, %arg5: memref<16x128xf32, #tpu.memory_space<vmem>>, %arg6: memref<16x128xf32, #tpu.memory_space<vmem>>, %arg7: memref<16x128xf32, #tpu.memory_space<vmem>>) attributes {dimension_semantics = [#tpu.dimension_semantics<parallel>], iteration_bounds = array<i64: 1>, scalar_prefetch = 0 : i64, scratch_operands = 4 : i64, tpu.core_type = #tpu.core_type<tc>, window_params = [{transform_indices = @transform_0, window_bounds = array<i64: 16, 128>}, {transform_indices = @transform_1, window_bounds = array<i64: 16, 128>}, {transform_indices = @transform_2, window_bounds = array<i64: 16, 128>}]} {
    %c0 = arith.constant 0 : index
    %c0_0 = arith.constant 0 : index
    %0 = vector.load %arg2[%c0, %c0_0] : memref<16x128xf32, #tpu.memory_space<vmem>>, vector<1x128xf32>
    %c1 = arith.constant 1 : index
    %c0_1 = arith.constant 0 : index
    %1 = vector.load %arg2[%c1, %c0_1] : memref<16x128xf32, #tpu.memory_space<vmem>>, vector<1x128xf32>
    %c2 = arith.constant 2 : index
    %c0_2 = arith.constant 0 : index
    %2 = vector.load %arg2[%c2, %c0_2] : memref<16x128xf32, #tpu.memory_space<vmem>>, vector<1x128xf32>
    %c3 = arith.constant 3 : index
    %c0_3 = arith.constant 0 : index
    %3 = vector.load %arg2[%c3, %c0_3] : memref<16x128xf32, #tpu.memory_space<vmem>>, vector<1x128xf32>
    %c4 = arith.constant 4 : index
    %c0_4 = arith.constant 0 : index
    %4 = vector.load %arg2[%c4, %c0_4] : memref<16x128xf32, #tpu.memory_space<vmem>>, vector<1x128xf32>
    %c5 = arith.constant 5 : index
    %c0_5 = arith.constant 0 : index
    %5 = vector.load %arg2[%c5, %c0_5] : memref<16x128xf32, #tpu.memory_space<vmem>>, vector<1x128xf32>
    %c6 = arith.constant 6 : index
    %c0_6 = arith.constant 0 : index
    %6 = vector.load %arg2[%c6, %c0_6] : memref<16x128xf32, #tpu.memory_space<vmem>>, vector<1x128xf32>
    %c7 = arith.constant 7 : index
    %c0_7 = arith.constant 0 : index
    %7 = vector.load %arg2[%c7, %c0_7] : memref<16x128xf32, #tpu.memory_space<vmem>>, vector<1x128xf32>
    %c8 = arith.constant 8 : index
    %c0_8 = arith.constant 0 : index
    %8 = vector.load %arg2[%c8, %c0_8] : memref<16x128xf32, #tpu.memory_space<vmem>>, vector<1x128xf32>
    %c9 = arith.constant 9 : index
    %c0_9 = arith.constant 0 : index
    %9 = vector.load %arg2[%c9, %c0_9] : memref<16x128xf32, #tpu.memory_space<vmem>>, vector<1x128xf32>
    %c10 = arith.constant 10 : index
    %c0_10 = arith.constant 0 : index
    %10 = vector.load %arg2[%c10, %c0_10] : memref<16x128xf32, #tpu.memory_space<vmem>>, vector<1x128xf32>
    %c11 = arith.constant 11 : index
    %c0_11 = arith.constant 0 : index
    %11 = vector.load %arg2[%c11, %c0_11] : memref<16x128xf32, #tpu.memory_space<vmem>>, vector<1x128xf32>
    %c12 = arith.constant 12 : index
    %c0_12 = arith.constant 0 : index
    %12 = vector.load %arg2[%c12, %c0_12] : memref<16x128xf32, #tpu.memory_space<vmem>>, vector<1x128xf32>
    %c13 = arith.constant 13 : index
    %c0_13 = arith.constant 0 : index
    %13 = vector.load %arg2[%c13, %c0_13] : memref<16x128xf32, #tpu.memory_space<vmem>>, vector<1x128xf32>
    %c0_14 = arith.constant 0 : index
    %c0_15 = arith.constant 0 : index
    %14 = vector.load %arg1[%c0_14, %c0_15] : memref<16x128xf32, #tpu.memory_space<vmem>>, vector<16x128xf32>
    %15 = vector.broadcast %0 : vector<1x128xf32> to vector<16x128xf32>
    %16 = arith.mulf %14, %15 : vector<16x128xf32>
    %17 = vector.broadcast %8 : vector<1x128xf32> to vector<16x128xf32>
    %18 = arith.addf %16, %17 : vector<16x128xf32>
    %c0_16 = arith.constant 0 : index
    %c0_17 = arith.constant 0 : index
    %19 = vector.load %arg4[%c0_16, %c0_17] : memref<16x128xf32, #tpu.memory_space<vmem>>, vector<16x128xf32>
    tpu.vector_store %arg4[%c0_16, %c0_17], %18 {strides = array<i32>} : memref<16x128xf32, #tpu.memory_space<vmem>>, vector<16x128xf32>,
    %20 = vector.broadcast %1 : vector<1x128xf32> to vector<16x128xf32>
    %21 = arith.mulf %14, %20 : vector<16x128xf32>
    %22 = vector.broadcast %9 : vector<1x128xf32> to vector<16x128xf32>
    %23 = arith.addf %21, %22 : vector<16x128xf32>
    %c0_18 = arith.constant 0 : index
    %c0_19 = arith.constant 0 : index
    %24 = vector.load %arg5[%c0_18, %c0_19] : memref<16x128xf32, #tpu.memory_space<vmem>>, vector<16x128xf32>
    tpu.vector_store %arg5[%c0_18, %c0_19], %23 {strides = array<i32>} : memref<16x128xf32, #tpu.memory_space<vmem>>, vector<16x128xf32>,
    %25 = vector.broadcast %2 : vector<1x128xf32> to vector<16x128xf32>
    %26 = arith.mulf %14, %25 : vector<16x128xf32>
    %27 = vector.broadcast %10 : vector<1x128xf32> to vector<16x128xf32>
    %28 = arith.addf %26, %27 : vector<16x128xf32>
    %c0_20 = arith.constant 0 : index
    %c0_21 = arith.constant 0 : index
    %29 = vector.load %arg6[%c0_20, %c0_21] : memref<16x128xf32, #tpu.memory_space<vmem>>, vector<16x128xf32>
    tpu.vector_store %arg6[%c0_20, %c0_21], %28 {strides = array<i32>} : memref<16x128xf32, #tpu.memory_space<vmem>>, vector<16x128xf32>,
    %30 = vector.broadcast %3 : vector<1x128xf32> to vector<16x128xf32>
    %31 = arith.mulf %14, %30 : vector<16x128xf32>
    %32 = vector.broadcast %11 : vector<1x128xf32> to vector<16x128xf32>
    %33 = arith.addf %31, %32 : vector<16x128xf32>
    %c0_22 = arith.constant 0 : index
    %c0_23 = arith.constant 0 : index
    %34 = vector.load %arg7[%c0_22, %c0_23] : memref<16x128xf32, #tpu.memory_space<vmem>>, vector<16x128xf32>
    tpu.vector_store %arg7[%c0_22, %c0_23], %33 {strides = array<i32>} : memref<16x128xf32, #tpu.memory_space<vmem>>, vector<16x128xf32>,
    %c0_i32 = arith.constant 0 : i32
    %35 = arith.index_cast %c0_i32 : i32 to index
    %c0_24 = arith.constant 0 : index
    %36 = vector.load %arg4[%35, %c0_24] : memref<16x128xf32, #tpu.memory_space<vmem>>, vector<1x128xf32>
    %37 = arith.mulf %4, %12 : vector<1x128xf32>
    %38 = arith.addf %36, %37 : vector<1x128xf32>
    %cst = arith.constant 5.000000e-01 : f32
    %39 = vector.broadcast %cst : f32 to vector<1x128xf32>
    %40 = arith.mulf %39, %38 : vector<1x128xf32>
    %41 = math.tanh %40 : vector<1x128xf32>
    %cst_25 = arith.constant 5.000000e-01 : f32
    %42 = vector.broadcast %cst_25 : f32 to vector<1x128xf32>
    %43 = arith.mulf %42, %41 : vector<1x128xf32>
    %cst_26 = arith.constant 5.000000e-01 : f32
    %44 = vector.broadcast %cst_26 : f32 to vector<1x128xf32>
    %45 = arith.addf %43, %44 : vector<1x128xf32>
    %46 = arith.index_cast %c0_i32 : i32 to index
    %c0_27 = arith.constant 0 : index
    %47 = vector.load %arg5[%46, %c0_27] : memref<16x128xf32, #tpu.memory_space<vmem>>, vector<1x128xf32>
    %48 = arith.mulf %5, %12 : vector<1x128xf32>
    %49 = arith.addf %47, %48 : vector<1x128xf32>
    %cst_28 = arith.constant 5.000000e-01 : f32
    %50 = vector.broadcast %cst_28 : f32 to vector<1x128xf32>
    %51 = arith.mulf %50, %49 : vector<1x128xf32>
    %52 = math.tanh %51 : vector<1x128xf32>
    %cst_29 = arith.constant 5.000000e-01 : f32
    %53 = vector.broadcast %cst_29 : f32 to vector<1x128xf32>
    %54 = arith.mulf %53, %52 : vector<1x128xf32>
    %cst_30 = arith.constant 5.000000e-01 : f32
    %55 = vector.broadcast %cst_30 : f32 to vector<1x128xf32>
    %56 = arith.addf %54, %55 : vector<1x128xf32>
    %57 = arith.index_cast %c0_i32 : i32 to index
    %c0_31 = arith.constant 0 : index
    %58 = vector.load %arg6[%57, %c0_31] : memref<16x128xf32, #tpu.memory_space<vmem>>, vector<1x128xf32>
    %59 = arith.mulf %6, %12 : vector<1x128xf32>
    %60 = arith.addf %58, %59 : vector<1x128xf32>
    %61 = math.tanh %60 : vector<1x128xf32>
    %62 = arith.index_cast %c0_i32 : i32 to index
    %c0_32 = arith.constant 0 : index
    %63 = vector.load %arg7[%62, %c0_32] : memref<16x128xf32, #tpu.memory_space<vmem>>, vector<1x128xf32>
    %64 = arith.mulf %7, %12 : vector<1x128xf32>
    %65 = arith.addf %63, %64 : vector<1x128xf32>
    %cst_33 = arith.constant 5.000000e-01 : f32
    %66 = vector.broadcast %cst_33 : f32 to vector<1x128xf32>
    %67 = arith.mulf %66, %65 : vector<1x128xf32>
    %68 = math.tanh %67 : vector<1x128xf32>
    %cst_34 = arith.constant 5.000000e-01 : f32
    %69 = vector.broadcast %cst_34 : f32 to vector<1x128xf32>
    %70 = arith.mulf %69, %68 : vector<1x128xf32>
    %cst_35 = arith.constant 5.000000e-01 : f32
    %71 = vector.broadcast %cst_35 : f32 to vector<1x128xf32>
    %72 = arith.addf %70, %71 : vector<1x128xf32>
    %73 = arith.mulf %56, %13 : vector<1x128xf32>
    %74 = arith.mulf %45, %61 : vector<1x128xf32>
    %75 = arith.addf %73, %74 : vector<1x128xf32>
    %76 = math.tanh %75 : vector<1x128xf32>
    %77 = arith.mulf %72, %76 : vector<1x128xf32>
    %cst_36 = arith.constant 2.000000e+00 : f32
    %78 = vector.broadcast %cst_36 : f32 to vector<1x128xf32>
    %79 = arith.mulf %78, %77 : vector<1x128xf32>
    %80 = arith.index_cast %c0_i32 : i32 to index
    %c0_37 = arith.constant 0 : index
    %81 = vector.load %arg3[%80, %c0_37] : memref<16x128xf32, #tpu.memory_space<vmem>>, vector<1x128xf32>
    tpu.vector_store %arg3[%80, %c0_37], %79 {strides = array<i32>} : memref<16x128xf32, #tpu.memory_space<vmem>>, vector<1x128xf32>,
    %c1_i32 = arith.constant 1 : i32
    %82 = arith.index_cast %c1_i32 : i32 to index
    %c0_38 = arith.constant 0 : index
    %83 = vector.load %arg4[%82, %c0_38] : memref<16x128xf32, #tpu.memory_space<vmem>>, vector<1x128xf32>
    %84 = arith.mulf %4, %77 : vector<1x128xf32>
    %85 = arith.addf %83, %84 : vector<1x128xf32>
    %cst_39 = arith.constant 5.000000e-01 : f32
    %86 = vector.broadcast %cst_39 : f32 to vector<1x128xf32>
    %87 = arith.mulf %86, %85 : vector<1x128xf32>
    %88 = math.tanh %87 : vector<1x128xf32>
    %cst_40 = arith.constant 5.000000e-01 : f32
    %89 = vector.broadcast %cst_40 : f32 to vector<1x128xf32>
    %90 = arith.mulf %89, %88 : vector<1x128xf32>
    %cst_41 = arith.constant 5.000000e-01 : f32
    %91 = vector.broadcast %cst_41 : f32 to vector<1x128xf32>
    %92 = arith.addf %90, %91 : vector<1x128xf32>
    %93 = arith.index_cast %c1_i32 : i32 to index
    %c0_42 = arith.constant 0 : index
    %94 = vector.load %arg5[%93, %c0_42] : memref<16x128xf32, #tpu.memory_space<vmem>>, vector<1x128xf32>
    %95 = arith.mulf %5, %77 : vector<1x128xf32>
    %96 = arith.addf %94, %95 : vector<1x128xf32>
    %cst_43 = arith.constant 5.000000e-01 : f32
    %97 = vector.broadcast %cst_43 : f32 to vector<1x128xf32>
    %98 = arith.mulf %97, %96 : vector<1x128xf32>
    %99 = math.tanh %98 : vector<1x128xf32>
    %cst_44 = arith.constant 5.000000e-01 : f32
    %100 = vector.broadcast %cst_44 : f32 to vector<1x128xf32>
    %101 = arith.mulf %100, %99 : vector<1x128xf32>
    %cst_45 = arith.constant 5.000000e-01 : f32
    %102 = vector.broadcast %cst_45 : f32 to vector<1x128xf32>
    %103 = arith.addf %101, %102 : vector<1x128xf32>
    %104 = arith.index_cast %c1_i32 : i32 to index
    %c0_46 = arith.constant 0 : index
    %105 = vector.load %arg6[%104, %c0_46] : memref<16x128xf32, #tpu.memory_space<vmem>>, vector<1x128xf32>
    %106 = arith.mulf %6, %77 : vector<1x128xf32>
    %107 = arith.addf %105, %106 : vector<1x128xf32>
    %108 = math.tanh %107 : vector<1x128xf32>
    %109 = arith.index_cast %c1_i32 : i32 to index
    %c0_47 = arith.constant 0 : index
    %110 = vector.load %arg7[%109, %c0_47] : memref<16x128xf32, #tpu.memory_space<vmem>>, vector<1x128xf32>
    %111 = arith.mulf %7, %77 : vector<1x128xf32>
    %112 = arith.addf %110, %111 : vector<1x128xf32>
    %cst_48 = arith.constant 5.000000e-01 : f32
    %113 = vector.broadcast %cst_48 : f32 to vector<1x128xf32>
    %114 = arith.mulf %113, %112 : vector<1x128xf32>
    %115 = math.tanh %114 : vector<1x128xf32>
    %cst_49 = arith.constant 5.000000e-01 : f32
    %116 = vector.broadcast %cst_49 : f32 to vector<1x128xf32>
    %117 = arith.mulf %116, %115 : vector<1x128xf32>
    %cst_50 = arith.constant 5.000000e-01 : f32
    %118 = vector.broadcast %cst_50 : f32 to vector<1x128xf32>
    %119 = arith.addf %117, %118 : vector<1x128xf32>
    %120 = arith.mulf %103, %75 : vector<1x128xf32>
    %121 = arith.mulf %92, %108 : vector<1x128xf32>
    %122 = arith.addf %120, %121 : vector<1x128xf32>
    %123 = math.tanh %122 : vector<1x128xf32>
    %124 = arith.mulf %119, %123 : vector<1x128xf32>
    %cst_51 = arith.constant 2.000000e+00 : f32
    %125 = vector.broadcast %cst_51 : f32 to vector<1x128xf32>
    %126 = arith.mulf %125, %124 : vector<1x128xf32>
    %127 = arith.index_cast %c1_i32 : i32 to index
    %c0_52 = arith.constant 0 : index
    %128 = vector.load %arg3[%127, %c0_52] : memref<16x128xf32, #tpu.memory_space<vmem>>, vector<1x128xf32>
    tpu.vector_store %arg3[%127, %c0_52], %126 {strides = array<i32>} : memref<16x128xf32, #tpu.memory_space<vmem>>, vector<1x128xf32>,
    %c2_i32 = arith.constant 2 : i32
    %129 = arith.index_cast %c2_i32 : i32 to index
    %c0_53 = arith.constant 0 : index
    %130 = vector.load %arg4[%129, %c0_53] : memref<16x128xf32, #tpu.memory_space<vmem>>, vector<1x128xf32>
    %131 = arith.mulf %4, %124 : vector<1x128xf32>
    %132 = arith.addf %130, %131 : vector<1x128xf32>
    %cst_54 = arith.constant 5.000000e-01 : f32
    %133 = vector.broadcast %cst_54 : f32 to vector<1x128xf32>
    %134 = arith.mulf %133, %132 : vector<1x128xf32>
    %135 = math.tanh %134 : vector<1x128xf32>
    %cst_55 = arith.constant 5.000000e-01 : f32
    %136 = vector.broadcast %cst_55 : f32 to vector<1x128xf32>
    %137 = arith.mulf %136, %135 : vector<1x128xf32>
    %cst_56 = arith.constant 5.000000e-01 : f32
    %138 = vector.broadcast %cst_56 : f32 to vector<1x128xf32>
    %139 = arith.addf %137, %138 : vector<1x128xf32>
    %140 = arith.index_cast %c2_i32 : i32 to index
    %c0_57 = arith.constant 0 : index
    %141 = vector.load %arg5[%140, %c0_57] : memref<16x128xf32, #tpu.memory_space<vmem>>, vector<1x128xf32>
    %142 = arith.mulf %5, %124 : vector<1x128xf32>
    %143 = arith.addf %141, %142 : vector<1x128xf32>
    %cst_58 = arith.constant 5.000000e-01 : f32
    %144 = vector.broadcast %cst_58 : f32 to vector<1x128xf32>
    %145 = arith.mulf %144, %143 : vector<1x128xf32>
    %146 = math.tanh %145 : vector<1x128xf32>
    %cst_59 = arith.constant 5.000000e-01 : f32
    %147 = vector.broadcast %cst_59 : f32 to vector<1x128xf32>
    %148 = arith.mulf %147, %146 : vector<1x128xf32>
    %cst_60 = arith.constant 5.000000e-01 : f32
    %149 = vector.broadcast %cst_60 : f32 to vector<1x128xf32>
    %150 = arith.addf %148, %149 : vector<1x128xf32>
    %151 = arith.index_cast %c2_i32 : i32 to index
    %c0_61 = arith.constant 0 : index
    %152 = vector.load %arg6[%151, %c0_61] : memref<16x128xf32, #tpu.memory_space<vmem>>, vector<1x128xf32>
    %153 = arith.mulf %6, %124 : vector<1x128xf32>
    %154 = arith.addf %152, %153 : vector<1x128xf32>
    %155 = math.tanh %154 : vector<1x128xf32>
    %156 = arith.index_cast %c2_i32 : i32 to index
    %c0_62 = arith.constant 0 : index
    %157 = vector.load %arg7[%156, %c0_62] : memref<16x128xf32, #tpu.memory_space<vmem>>, vector<1x128xf32>
    %158 = arith.mulf %7, %124 : vector<1x128xf32>
    %159 = arith.addf %157, %158 : vector<1x128xf32>
    %cst_63 = arith.constant 5.000000e-01 : f32
    %160 = vector.broadcast %cst_63 : f32 to vector<1x128xf32>
    %161 = arith.mulf %160, %159 : vector<1x128xf32>
    %162 = math.tanh %161 : vector<1x128xf32>
    %cst_64 = arith.constant 5.000000e-01 : f32
    %163 = vector.broadcast %cst_64 : f32 to vector<1x128xf32>
    %164 = arith.mulf %163, %162 : vector<1x128xf32>
    %cst_65 = arith.constant 5.000000e-01 : f32
    %165 = vector.broadcast %cst_65 : f32 to vector<1x128xf32>
    %166 = arith.addf %164, %165 : vector<1x128xf32>
    %167 = arith.mulf %150, %122 : vector<1x128xf32>
    %168 = arith.mulf %139, %155 : vector<1x128xf32>
    %169 = arith.addf %167, %168 : vector<1x128xf32>
    %170 = math.tanh %169 : vector<1x128xf32>
    %171 = arith.mulf %166, %170 : vector<1x128xf32>
    %cst_66 = arith.constant 2.000000e+00 : f32
    %172 = vector.broadcast %cst_66 : f32 to vector<1x128xf32>
    %173 = arith.mulf %172, %171 : vector<1x128xf32>
    %174 = arith.index_cast %c2_i32 : i32 to index
    %c0_67 = arith.constant 0 : index
    %175 = vector.load %arg3[%174, %c0_67] : memref<16x128xf32, #tpu.memory_space<vmem>>, vector<1x128xf32>
    tpu.vector_store %arg3[%174, %c0_67], %173 {strides = array<i32>} : memref<16x128xf32, #tpu.memory_space<vmem>>, vector<1x128xf32>,
    %c3_i32 = arith.constant 3 : i32
    %176 = arith.index_cast %c3_i32 : i32 to index
    %c0_68 = arith.constant 0 : index
    %177 = vector.load %arg4[%176, %c0_68] : memref<16x128xf32, #tpu.memory_space<vmem>>, vector<1x128xf32>
    %178 = arith.mulf %4, %171 : vector<1x128xf32>
    %179 = arith.addf %177, %178 : vector<1x128xf32>
    %cst_69 = arith.constant 5.000000e-01 : f32
    %180 = vector.broadcast %cst_69 : f32 to vector<1x128xf32>
    %181 = arith.mulf %180, %179 : vector<1x128xf32>
    %182 = math.tanh %181 : vector<1x128xf32>
    %cst_70 = arith.constant 5.000000e-01 : f32
    %183 = vector.broadcast %cst_70 : f32 to vector<1x128xf32>
    %184 = arith.mulf %183, %182 : vector<1x128xf32>
    %cst_71 = arith.constant 5.000000e-01 : f32
    %185 = vector.broadcast %cst_71 : f32 to vector<1x128xf32>
    %186 = arith.addf %184, %185 : vector<1x128xf32>
    %187 = arith.index_cast %c3_i32 : i32 to index
    %c0_72 = arith.constant 0 : index
    %188 = vector.load %arg5[%187, %c0_72] : memref<16x128xf32, #tpu.memory_space<vmem>>, vector<1x128xf32>
    %189 = arith.mulf %5, %171 : vector<1x128xf32>
    %190 = arith.addf %188, %189 : vector<1x128xf32>
    %cst_73 = arith.constant 5.000000e-01 : f32
    %191 = vector.broadcast %cst_73 : f32 to vector<1x128xf32>
    %192 = arith.mulf %191, %190 : vector<1x128xf32>
    %193 = math.tanh %192 : vector<1x128xf32>
    %cst_74 = arith.constant 5.000000e-01 : f32
    %194 = vector.broadcast %cst_74 : f32 to vector<1x128xf32>
    %195 = arith.mulf %194, %193 : vector<1x128xf32>
    %cst_75 = arith.constant 5.000000e-01 : f32
    %196 = vector.broadcast %cst_75 : f32 to vector<1x128xf32>
    %197 = arith.addf %195, %196 : vector<1x128xf32>
    %198 = arith.index_cast %c3_i32 : i32 to index
    %c0_76 = arith.constant 0 : index
    %199 = vector.load %arg6[%198, %c0_76] : memref<16x128xf32, #tpu.memory_space<vmem>>, vector<1x128xf32>
    %200 = arith.mulf %6, %171 : vector<1x128xf32>
    %201 = arith.addf %199, %200 : vector<1x128xf32>
    %202 = math.tanh %201 : vector<1x128xf32>
    %203 = arith.index_cast %c3_i32 : i32 to index
    %c0_77 = arith.constant 0 : index
    %204 = vector.load %arg7[%203, %c0_77] : memref<16x128xf32, #tpu.memory_space<vmem>>, vector<1x128xf32>
    %205 = arith.mulf %7, %171 : vector<1x128xf32>
    %206 = arith.addf %204, %205 : vector<1x128xf32>
    %cst_78 = arith.constant 5.000000e-01 : f32
    %207 = vector.broadcast %cst_78 : f32 to vector<1x128xf32>
    %208 = arith.mulf %207, %206 : vector<1x128xf32>
    %209 = math.tanh %208 : vector<1x128xf32>
    %cst_79 = arith.constant 5.000000e-01 : f32
    %210 = vector.broadcast %cst_79 : f32 to vector<1x128xf32>
    %211 = arith.mulf %210, %209 : vector<1x128xf32>
    %cst_80 = arith.constant 5.000000e-01 : f32
    %212 = vector.broadcast %cst_80 : f32 to vector<1x128xf32>
    %213 = arith.addf %211, %212 : vector<1x128xf32>
    %214 = arith.mulf %197, %169 : vector<1x128xf32>
    %215 = arith.mulf %186, %202 : vector<1x128xf32>
    %216 = arith.addf %214, %215 : vector<1x128xf32>
    %217 = math.tanh %216 : vector<1x128xf32>
    %218 = arith.mulf %213, %217 : vector<1x128xf32>
    %cst_81 = arith.constant 2.000000e+00 : f32
    %219 = vector.broadcast %cst_81 : f32 to vector<1x128xf32>
    %220 = arith.mulf %219, %218 : vector<1x128xf32>
    %221 = arith.index_cast %c3_i32 : i32 to index
    %c0_82 = arith.constant 0 : index
    %222 = vector.load %arg3[%221, %c0_82] : memref<16x128xf32, #tpu.memory_space<vmem>>, vector<1x128xf32>
    tpu.vector_store %arg3[%221, %c0_82], %220 {strides = array<i32>} : memref<16x128xf32, #tpu.memory_space<vmem>>, vector<1x128xf32>,
    %c4_i32 = arith.constant 4 : i32
    %223 = arith.index_cast %c4_i32 : i32 to index
    %c0_83 = arith.constant 0 : index
    %224 = vector.load %arg4[%223, %c0_83] : memref<16x128xf32, #tpu.memory_space<vmem>>, vector<1x128xf32>
    %225 = arith.mulf %4, %218 : vector<1x128xf32>
    %226 = arith.addf %224, %225 : vector<1x128xf32>
    %cst_84 = arith.constant 5.000000e-01 : f32
    %227 = vector.broadcast %cst_84 : f32 to vector<1x128xf32>
    %228 = arith.mulf %227, %226 : vector<1x128xf32>
    %229 = math.tanh %228 : vector<1x128xf32>
    %cst_85 = arith.constant 5.000000e-01 : f32
    %230 = vector.broadcast %cst_85 : f32 to vector<1x128xf32>
    %231 = arith.mulf %230, %229 : vector<1x128xf32>
    %cst_86 = arith.constant 5.000000e-01 : f32
    %232 = vector.broadcast %cst_86 : f32 to vector<1x128xf32>
    %233 = arith.addf %231, %232 : vector<1x128xf32>
    %234 = arith.index_cast %c4_i32 : i32 to index
    %c0_87 = arith.constant 0 : index
    %235 = vector.load %arg5[%234, %c0_87] : memref<16x128xf32, #tpu.memory_space<vmem>>, vector<1x128xf32>
    %236 = arith.mulf %5, %218 : vector<1x128xf32>
    %237 = arith.addf %235, %236 : vector<1x128xf32>
    %cst_88 = arith.constant 5.000000e-01 : f32
    %238 = vector.broadcast %cst_88 : f32 to vector<1x128xf32>
    %239 = arith.mulf %238, %237 : vector<1x128xf32>
    %240 = math.tanh %239 : vector<1x128xf32>
    %cst_89 = arith.constant 5.000000e-01 : f32
    %241 = vector.broadcast %cst_89 : f32 to vector<1x128xf32>
    %242 = arith.mulf %241, %240 : vector<1x128xf32>
    %cst_90 = arith.constant 5.000000e-01 : f32
    %243 = vector.broadcast %cst_90 : f32 to vector<1x128xf32>
    %244 = arith.addf %242, %243 : vector<1x128xf32>
    %245 = arith.index_cast %c4_i32 : i32 to index
    %c0_91 = arith.constant 0 : index
    %246 = vector.load %arg6[%245, %c0_91] : memref<16x128xf32, #tpu.memory_space<vmem>>, vector<1x128xf32>
    %247 = arith.mulf %6, %218 : vector<1x128xf32>
    %248 = arith.addf %246, %247 : vector<1x128xf32>
    %249 = math.tanh %248 : vector<1x128xf32>
    %250 = arith.index_cast %c4_i32 : i32 to index
    %c0_92 = arith.constant 0 : index
    %251 = vector.load %arg7[%250, %c0_92] : memref<16x128xf32, #tpu.memory_space<vmem>>, vector<1x128xf32>
    %252 = arith.mulf %7, %218 : vector<1x128xf32>
    %253 = arith.addf %251, %252 : vector<1x128xf32>
    %cst_93 = arith.constant 5.000000e-01 : f32
    %254 = vector.broadcast %cst_93 : f32 to vector<1x128xf32>
    %255 = arith.mulf %254, %253 : vector<1x128xf32>
    %256 = math.tanh %255 : vector<1x128xf32>
    %cst_94 = arith.constant 5.000000e-01 : f32
    %257 = vector.broadcast %cst_94 : f32 to vector<1x128xf32>
    %258 = arith.mulf %257, %256 : vector<1x128xf32>
    %cst_95 = arith.constant 5.000000e-01 : f32
    %259 = vector.broadcast %cst_95 : f32 to vector<1x128xf32>
    %260 = arith.addf %258, %259 : vector<1x128xf32>
    %261 = arith.mulf %244, %216 : vector<1x128xf32>
    %262 = arith.mulf %233, %249 : vector<1x128xf32>
    %263 = arith.addf %261, %262 : vector<1x128xf32>
    %264 = math.tanh %263 : vector<1x128xf32>
    %265 = arith.mulf %260, %264 : vector<1x128xf32>
    %cst_96 = arith.constant 2.000000e+00 : f32
    %266 = vector.broadcast %cst_96 : f32 to vector<1x128xf32>
    %267 = arith.mulf %266, %265 : vector<1x128xf32>
    %268 = arith.index_cast %c4_i32 : i32 to index
    %c0_97 = arith.constant 0 : index
    %269 = vector.load %arg3[%268, %c0_97] : memref<16x128xf32, #tpu.memory_space<vmem>>, vector<1x128xf32>
    tpu.vector_store %arg3[%268, %c0_97], %267 {strides = array<i32>} : memref<16x128xf32, #tpu.memory_space<vmem>>, vector<1x128xf32>,
    %c5_i32 = arith.constant 5 : i32
    %270 = arith.index_cast %c5_i32 : i32 to index
    %c0_98 = arith.constant 0 : index
    %271 = vector.load %arg4[%270, %c0_98] : memref<16x128xf32, #tpu.memory_space<vmem>>, vector<1x128xf32>
    %272 = arith.mulf %4, %265 : vector<1x128xf32>
    %273 = arith.addf %271, %272 : vector<1x128xf32>
    %cst_99 = arith.constant 5.000000e-01 : f32
    %274 = vector.broadcast %cst_99 : f32 to vector<1x128xf32>
    %275 = arith.mulf %274, %273 : vector<1x128xf32>
    %276 = math.tanh %275 : vector<1x128xf32>
    %cst_100 = arith.constant 5.000000e-01 : f32
    %277 = vector.broadcast %cst_100 : f32 to vector<1x128xf32>
    %278 = arith.mulf %277, %276 : vector<1x128xf32>
    %cst_101 = arith.constant 5.000000e-01 : f32
    %279 = vector.broadcast %cst_101 : f32 to vector<1x128xf32>
    %280 = arith.addf %278, %279 : vector<1x128xf32>
    %281 = arith.index_cast %c5_i32 : i32 to index
    %c0_102 = arith.constant 0 : index
    %282 = vector.load %arg5[%281, %c0_102] : memref<16x128xf32, #tpu.memory_space<vmem>>, vector<1x128xf32>
    %283 = arith.mulf %5, %265 : vector<1x128xf32>
    %284 = arith.addf %282, %283 : vector<1x128xf32>
    %cst_103 = arith.constant 5.000000e-01 : f32
    %285 = vector.broadcast %cst_103 : f32 to vector<1x128xf32>
    %286 = arith.mulf %285, %284 : vector<1x128xf32>
    %287 = math.tanh %286 : vector<1x128xf32>
    %cst_104 = arith.constant 5.000000e-01 : f32
    %288 = vector.broadcast %cst_104 : f32 to vector<1x128xf32>
    %289 = arith.mulf %288, %287 : vector<1x128xf32>
    %cst_105 = arith.constant 5.000000e-01 : f32
    %290 = vector.broadcast %cst_105 : f32 to vector<1x128xf32>
    %291 = arith.addf %289, %290 : vector<1x128xf32>
    %292 = arith.index_cast %c5_i32 : i32 to index
    %c0_106 = arith.constant 0 : index
    %293 = vector.load %arg6[%292, %c0_106] : memref<16x128xf32, #tpu.memory_space<vmem>>, vector<1x128xf32>
    %294 = arith.mulf %6, %265 : vector<1x128xf32>
    %295 = arith.addf %293, %294 : vector<1x128xf32>
    %296 = math.tanh %295 : vector<1x128xf32>
    %297 = arith.index_cast %c5_i32 : i32 to index
    %c0_107 = arith.constant 0 : index
    %298 = vector.load %arg7[%297, %c0_107] : memref<16x128xf32, #tpu.memory_space<vmem>>, vector<1x128xf32>
    %299 = arith.mulf %7, %265 : vector<1x128xf32>
    %300 = arith.addf %298, %299 : vector<1x128xf32>
    %cst_108 = arith.constant 5.000000e-01 : f32
    %301 = vector.broadcast %cst_108 : f32 to vector<1x128xf32>
    %302 = arith.mulf %301, %300 : vector<1x128xf32>
    %303 = math.tanh %302 : vector<1x128xf32>
    %cst_109 = arith.constant 5.000000e-01 : f32
    %304 = vector.broadcast %cst_109 : f32 to vector<1x128xf32>
    %305 = arith.mulf %304, %303 : vector<1x128xf32>
    %cst_110 = arith.constant 5.000000e-01 : f32
    %306 = vector.broadcast %cst_110 : f32 to vector<1x128xf32>
    %307 = arith.addf %305, %306 : vector<1x128xf32>
    %308 = arith.mulf %291, %263 : vector<1x128xf32>
    %309 = arith.mulf %280, %296 : vector<1x128xf32>
    %310 = arith.addf %308, %309 : vector<1x128xf32>
    %311 = math.tanh %310 : vector<1x128xf32>
    %312 = arith.mulf %307, %311 : vector<1x128xf32>
    %cst_111 = arith.constant 2.000000e+00 : f32
    %313 = vector.broadcast %cst_111 : f32 to vector<1x128xf32>
    %314 = arith.mulf %313, %312 : vector<1x128xf32>
    %315 = arith.index_cast %c5_i32 : i32 to index
    %c0_112 = arith.constant 0 : index
    %316 = vector.load %arg3[%315, %c0_112] : memref<16x128xf32, #tpu.memory_space<vmem>>, vector<1x128xf32>
    tpu.vector_store %arg3[%315, %c0_112], %314 {strides = array<i32>} : memref<16x128xf32, #tpu.memory_space<vmem>>, vector<1x128xf32>,
    %c6_i32 = arith.constant 6 : i32
    %317 = arith.index_cast %c6_i32 : i32 to index
    %c0_113 = arith.constant 0 : index
    %318 = vector.load %arg4[%317, %c0_113] : memref<16x128xf32, #tpu.memory_space<vmem>>, vector<1x128xf32>
    %319 = arith.mulf %4, %312 : vector<1x128xf32>
    %320 = arith.addf %318, %319 : vector<1x128xf32>
    %cst_114 = arith.constant 5.000000e-01 : f32
    %321 = vector.broadcast %cst_114 : f32 to vector<1x128xf32>
    %322 = arith.mulf %321, %320 : vector<1x128xf32>
    %323 = math.tanh %322 : vector<1x128xf32>
    %cst_115 = arith.constant 5.000000e-01 : f32
    %324 = vector.broadcast %cst_115 : f32 to vector<1x128xf32>
    %325 = arith.mulf %324, %323 : vector<1x128xf32>
    %cst_116 = arith.constant 5.000000e-01 : f32
    %326 = vector.broadcast %cst_116 : f32 to vector<1x128xf32>
    %327 = arith.addf %325, %326 : vector<1x128xf32>
    %328 = arith.index_cast %c6_i32 : i32 to index
    %c0_117 = arith.constant 0 : index
    %329 = vector.load %arg5[%328, %c0_117] : memref<16x128xf32, #tpu.memory_space<vmem>>, vector<1x128xf32>
    %330 = arith.mulf %5, %312 : vector<1x128xf32>
    %331 = arith.addf %329, %330 : vector<1x128xf32>
    %cst_118 = arith.constant 5.000000e-01 : f32
    %332 = vector.broadcast %cst_118 : f32 to vector<1x128xf32>
    %333 = arith.mulf %332, %331 : vector<1x128xf32>
    %334 = math.tanh %333 : vector<1x128xf32>
    %cst_119 = arith.constant 5.000000e-01 : f32
    %335 = vector.broadcast %cst_119 : f32 to vector<1x128xf32>
    %336 = arith.mulf %335, %334 : vector<1x128xf32>
    %cst_120 = arith.constant 5.000000e-01 : f32
    %337 = vector.broadcast %cst_120 : f32 to vector<1x128xf32>
    %338 = arith.addf %336, %337 : vector<1x128xf32>
    %339 = arith.index_cast %c6_i32 : i32 to index
    %c0_121 = arith.constant 0 : index
    %340 = vector.load %arg6[%339, %c0_121] : memref<16x128xf32, #tpu.memory_space<vmem>>, vector<1x128xf32>
    %341 = arith.mulf %6, %312 : vector<1x128xf32>
    %342 = arith.addf %340, %341 : vector<1x128xf32>
    %343 = math.tanh %342 : vector<1x128xf32>
    %344 = arith.index_cast %c6_i32 : i32 to index
    %c0_122 = arith.constant 0 : index
    %345 = vector.load %arg7[%344, %c0_122] : memref<16x128xf32, #tpu.memory_space<vmem>>, vector<1x128xf32>
    %346 = arith.mulf %7, %312 : vector<1x128xf32>
    %347 = arith.addf %345, %346 : vector<1x128xf32>
    %cst_123 = arith.constant 5.000000e-01 : f32
    %348 = vector.broadcast %cst_123 : f32 to vector<1x128xf32>
    %349 = arith.mulf %348, %347 : vector<1x128xf32>
    %350 = math.tanh %349 : vector<1x128xf32>
    %cst_124 = arith.constant 5.000000e-01 : f32
    %351 = vector.broadcast %cst_124 : f32 to vector<1x128xf32>
    %352 = arith.mulf %351, %350 : vector<1x128xf32>
    %cst_125 = arith.constant 5.000000e-01 : f32
    %353 = vector.broadcast %cst_125 : f32 to vector<1x128xf32>
    %354 = arith.addf %352, %353 : vector<1x128xf32>
    %355 = arith.mulf %338, %310 : vector<1x128xf32>
    %356 = arith.mulf %327, %343 : vector<1x128xf32>
    %357 = arith.addf %355, %356 : vector<1x128xf32>
    %358 = math.tanh %357 : vector<1x128xf32>
    %359 = arith.mulf %354, %358 : vector<1x128xf32>
    %cst_126 = arith.constant 2.000000e+00 : f32
    %360 = vector.broadcast %cst_126 : f32 to vector<1x128xf32>
    %361 = arith.mulf %360, %359 : vector<1x128xf32>
    %362 = arith.index_cast %c6_i32 : i32 to index
    %c0_127 = arith.constant 0 : index
    %363 = vector.load %arg3[%362, %c0_127] : memref<16x128xf32, #tpu.memory_space<vmem>>, vector<1x128xf32>
    tpu.vector_store %arg3[%362, %c0_127], %361 {strides = array<i32>} : memref<16x128xf32, #tpu.memory_space<vmem>>, vector<1x128xf32>,
    %c7_i32 = arith.constant 7 : i32
    %364 = arith.index_cast %c7_i32 : i32 to index
    %c0_128 = arith.constant 0 : index
    %365 = vector.load %arg4[%364, %c0_128] : memref<16x128xf32, #tpu.memory_space<vmem>>, vector<1x128xf32>
    %366 = arith.mulf %4, %359 : vector<1x128xf32>
    %367 = arith.addf %365, %366 : vector<1x128xf32>
    %cst_129 = arith.constant 5.000000e-01 : f32
    %368 = vector.broadcast %cst_129 : f32 to vector<1x128xf32>
    %369 = arith.mulf %368, %367 : vector<1x128xf32>
    %370 = math.tanh %369 : vector<1x128xf32>
    %cst_130 = arith.constant 5.000000e-01 : f32
    %371 = vector.broadcast %cst_130 : f32 to vector<1x128xf32>
    %372 = arith.mulf %371, %370 : vector<1x128xf32>
    %cst_131 = arith.constant 5.000000e-01 : f32
    %373 = vector.broadcast %cst_131 : f32 to vector<1x128xf32>
    %374 = arith.addf %372, %373 : vector<1x128xf32>
    %375 = arith.index_cast %c7_i32 : i32 to index
    %c0_132 = arith.constant 0 : index
    %376 = vector.load %arg5[%375, %c0_132] : memref<16x128xf32, #tpu.memory_space<vmem>>, vector<1x128xf32>
    %377 = arith.mulf %5, %359 : vector<1x128xf32>
    %378 = arith.addf %376, %377 : vector<1x128xf32>
    %cst_133 = arith.constant 5.000000e-01 : f32
    %379 = vector.broadcast %cst_133 : f32 to vector<1x128xf32>
    %380 = arith.mulf %379, %378 : vector<1x128xf32>
    %381 = math.tanh %380 : vector<1x128xf32>
    %cst_134 = arith.constant 5.000000e-01 : f32
    %382 = vector.broadcast %cst_134 : f32 to vector<1x128xf32>
    %383 = arith.mulf %382, %381 : vector<1x128xf32>
    %cst_135 = arith.constant 5.000000e-01 : f32
    %384 = vector.broadcast %cst_135 : f32 to vector<1x128xf32>
    %385 = arith.addf %383, %384 : vector<1x128xf32>
    %386 = arith.index_cast %c7_i32 : i32 to index
    %c0_136 = arith.constant 0 : index
    %387 = vector.load %arg6[%386, %c0_136] : memref<16x128xf32, #tpu.memory_space<vmem>>, vector<1x128xf32>
    %388 = arith.mulf %6, %359 : vector<1x128xf32>
    %389 = arith.addf %387, %388 : vector<1x128xf32>
    %390 = math.tanh %389 : vector<1x128xf32>
    %391 = arith.index_cast %c7_i32 : i32 to index
    %c0_137 = arith.constant 0 : index
    %392 = vector.load %arg7[%391, %c0_137] : memref<16x128xf32, #tpu.memory_space<vmem>>, vector<1x128xf32>
    %393 = arith.mulf %7, %359 : vector<1x128xf32>
    %394 = arith.addf %392, %393 : vector<1x128xf32>
    %cst_138 = arith.constant 5.000000e-01 : f32
    %395 = vector.broadcast %cst_138 : f32 to vector<1x128xf32>
    %396 = arith.mulf %395, %394 : vector<1x128xf32>
    %397 = math.tanh %396 : vector<1x128xf32>
    %cst_139 = arith.constant 5.000000e-01 : f32
    %398 = vector.broadcast %cst_139 : f32 to vector<1x128xf32>
    %399 = arith.mulf %398, %397 : vector<1x128xf32>
    %cst_140 = arith.constant 5.000000e-01 : f32
    %400 = vector.broadcast %cst_140 : f32 to vector<1x128xf32>
    %401 = arith.addf %399, %400 : vector<1x128xf32>
    %402 = arith.mulf %385, %357 : vector<1x128xf32>
    %403 = arith.mulf %374, %390 : vector<1x128xf32>
    %404 = arith.addf %402, %403 : vector<1x128xf32>
    %405 = math.tanh %404 : vector<1x128xf32>
    %406 = arith.mulf %401, %405 : vector<1x128xf32>
    %cst_141 = arith.constant 2.000000e+00 : f32
    %407 = vector.broadcast %cst_141 : f32 to vector<1x128xf32>
    %408 = arith.mulf %407, %406 : vector<1x128xf32>
    %409 = arith.index_cast %c7_i32 : i32 to index
    %c0_142 = arith.constant 0 : index
    %410 = vector.load %arg3[%409, %c0_142] : memref<16x128xf32, #tpu.memory_space<vmem>>, vector<1x128xf32>
    tpu.vector_store %arg3[%409, %c0_142], %408 {strides = array<i32>} : memref<16x128xf32, #tpu.memory_space<vmem>>, vector<1x128xf32>,
    %c8_i32 = arith.constant 8 : i32
    %411 = arith.index_cast %c8_i32 : i32 to index
    %c0_143 = arith.constant 0 : index
    %412 = vector.load %arg4[%411, %c0_143] : memref<16x128xf32, #tpu.memory_space<vmem>>, vector<1x128xf32>
    %413 = arith.mulf %4, %406 : vector<1x128xf32>
    %414 = arith.addf %412, %413 : vector<1x128xf32>
    %cst_144 = arith.constant 5.000000e-01 : f32
    %415 = vector.broadcast %cst_144 : f32 to vector<1x128xf32>
    %416 = arith.mulf %415, %414 : vector<1x128xf32>
    %417 = math.tanh %416 : vector<1x128xf32>
    %cst_145 = arith.constant 5.000000e-01 : f32
    %418 = vector.broadcast %cst_145 : f32 to vector<1x128xf32>
    %419 = arith.mulf %418, %417 : vector<1x128xf32>
    %cst_146 = arith.constant 5.000000e-01 : f32
    %420 = vector.broadcast %cst_146 : f32 to vector<1x128xf32>
    %421 = arith.addf %419, %420 : vector<1x128xf32>
    %422 = arith.index_cast %c8_i32 : i32 to index
    %c0_147 = arith.constant 0 : index
    %423 = vector.load %arg5[%422, %c0_147] : memref<16x128xf32, #tpu.memory_space<vmem>>, vector<1x128xf32>
    %424 = arith.mulf %5, %406 : vector<1x128xf32>
    %425 = arith.addf %423, %424 : vector<1x128xf32>
    %cst_148 = arith.constant 5.000000e-01 : f32
    %426 = vector.broadcast %cst_148 : f32 to vector<1x128xf32>
    %427 = arith.mulf %426, %425 : vector<1x128xf32>
    %428 = math.tanh %427 : vector<1x128xf32>
    %cst_149 = arith.constant 5.000000e-01 : f32
    %429 = vector.broadcast %cst_149 : f32 to vector<1x128xf32>
    %430 = arith.mulf %429, %428 : vector<1x128xf32>
    %cst_150 = arith.constant 5.000000e-01 : f32
    %431 = vector.broadcast %cst_150 : f32 to vector<1x128xf32>
    %432 = arith.addf %430, %431 : vector<1x128xf32>
    %433 = arith.index_cast %c8_i32 : i32 to index
    %c0_151 = arith.constant 0 : index
    %434 = vector.load %arg6[%433, %c0_151] : memref<16x128xf32, #tpu.memory_space<vmem>>, vector<1x128xf32>
    %435 = arith.mulf %6, %406 : vector<1x128xf32>
    %436 = arith.addf %434, %435 : vector<1x128xf32>
    %437 = math.tanh %436 : vector<1x128xf32>
    %438 = arith.index_cast %c8_i32 : i32 to index
    %c0_152 = arith.constant 0 : index
    %439 = vector.load %arg7[%438, %c0_152] : memref<16x128xf32, #tpu.memory_space<vmem>>, vector<1x128xf32>
    %440 = arith.mulf %7, %406 : vector<1x128xf32>
    %441 = arith.addf %439, %440 : vector<1x128xf32>
    %cst_153 = arith.constant 5.000000e-01 : f32
    %442 = vector.broadcast %cst_153 : f32 to vector<1x128xf32>
    %443 = arith.mulf %442, %441 : vector<1x128xf32>
    %444 = math.tanh %443 : vector<1x128xf32>
    %cst_154 = arith.constant 5.000000e-01 : f32
    %445 = vector.broadcast %cst_154 : f32 to vector<1x128xf32>
    %446 = arith.mulf %445, %444 : vector<1x128xf32>
    %cst_155 = arith.constant 5.000000e-01 : f32
    %447 = vector.broadcast %cst_155 : f32 to vector<1x128xf32>
    %448 = arith.addf %446, %447 : vector<1x128xf32>
    %449 = arith.mulf %432, %404 : vector<1x128xf32>
    %450 = arith.mulf %421, %437 : vector<1x128xf32>
    %451 = arith.addf %449, %450 : vector<1x128xf32>
    %452 = math.tanh %451 : vector<1x128xf32>
    %453 = arith.mulf %448, %452 : vector<1x128xf32>
    %cst_156 = arith.constant 2.000000e+00 : f32
    %454 = vector.broadcast %cst_156 : f32 to vector<1x128xf32>
    %455 = arith.mulf %454, %453 : vector<1x128xf32>
    %456 = arith.index_cast %c8_i32 : i32 to index
    %c0_157 = arith.constant 0 : index
    %457 = vector.load %arg3[%456, %c0_157] : memref<16x128xf32, #tpu.memory_space<vmem>>, vector<1x128xf32>
    tpu.vector_store %arg3[%456, %c0_157], %455 {strides = array<i32>} : memref<16x128xf32, #tpu.memory_space<vmem>>, vector<1x128xf32>,
    %c9_i32 = arith.constant 9 : i32
    %458 = arith.index_cast %c9_i32 : i32 to index
    %c0_158 = arith.constant 0 : index
    %459 = vector.load %arg4[%458, %c0_158] : memref<16x128xf32, #tpu.memory_space<vmem>>, vector<1x128xf32>
    %460 = arith.mulf %4, %453 : vector<1x128xf32>
    %461 = arith.addf %459, %460 : vector<1x128xf32>
    %cst_159 = arith.constant 5.000000e-01 : f32
    %462 = vector.broadcast %cst_159 : f32 to vector<1x128xf32>
    %463 = arith.mulf %462, %461 : vector<1x128xf32>
    %464 = math.tanh %463 : vector<1x128xf32>
    %cst_160 = arith.constant 5.000000e-01 : f32
    %465 = vector.broadcast %cst_160 : f32 to vector<1x128xf32>
    %466 = arith.mulf %465, %464 : vector<1x128xf32>
    %cst_161 = arith.constant 5.000000e-01 : f32
    %467 = vector.broadcast %cst_161 : f32 to vector<1x128xf32>
    %468 = arith.addf %466, %467 : vector<1x128xf32>
    %469 = arith.index_cast %c9_i32 : i32 to index
    %c0_162 = arith.constant 0 : index
    %470 = vector.load %arg5[%469, %c0_162] : memref<16x128xf32, #tpu.memory_space<vmem>>, vector<1x128xf32>
    %471 = arith.mulf %5, %453 : vector<1x128xf32>
    %472 = arith.addf %470, %471 : vector<1x128xf32>
    %cst_163 = arith.constant 5.000000e-01 : f32
    %473 = vector.broadcast %cst_163 : f32 to vector<1x128xf32>
    %474 = arith.mulf %473, %472 : vector<1x128xf32>
    %475 = math.tanh %474 : vector<1x128xf32>
    %cst_164 = arith.constant 5.000000e-01 : f32
    %476 = vector.broadcast %cst_164 : f32 to vector<1x128xf32>
    %477 = arith.mulf %476, %475 : vector<1x128xf32>
    %cst_165 = arith.constant 5.000000e-01 : f32
    %478 = vector.broadcast %cst_165 : f32 to vector<1x128xf32>
    %479 = arith.addf %477, %478 : vector<1x128xf32>
    %480 = arith.index_cast %c9_i32 : i32 to index
    %c0_166 = arith.constant 0 : index
    %481 = vector.load %arg6[%480, %c0_166] : memref<16x128xf32, #tpu.memory_space<vmem>>, vector<1x128xf32>
    %482 = arith.mulf %6, %453 : vector<1x128xf32>
    %483 = arith.addf %481, %482 : vector<1x128xf32>
    %484 = math.tanh %483 : vector<1x128xf32>
    %485 = arith.index_cast %c9_i32 : i32 to index
    %c0_167 = arith.constant 0 : index
    %486 = vector.load %arg7[%485, %c0_167] : memref<16x128xf32, #tpu.memory_space<vmem>>, vector<1x128xf32>
    %487 = arith.mulf %7, %453 : vector<1x128xf32>
    %488 = arith.addf %486, %487 : vector<1x128xf32>
    %cst_168 = arith.constant 5.000000e-01 : f32
    %489 = vector.broadcast %cst_168 : f32 to vector<1x128xf32>
    %490 = arith.mulf %489, %488 : vector<1x128xf32>
    %491 = math.tanh %490 : vector<1x128xf32>
    %cst_169 = arith.constant 5.000000e-01 : f32
    %492 = vector.broadcast %cst_169 : f32 to vector<1x128xf32>
    %493 = arith.mulf %492, %491 : vector<1x128xf32>
    %cst_170 = arith.constant 5.000000e-01 : f32
    %494 = vector.broadcast %cst_170 : f32 to vector<1x128xf32>
    %495 = arith.addf %493, %494 : vector<1x128xf32>
    %496 = arith.mulf %479, %451 : vector<1x128xf32>
    %497 = arith.mulf %468, %484 : vector<1x128xf32>
    %498 = arith.addf %496, %497 : vector<1x128xf32>
    %499 = math.tanh %498 : vector<1x128xf32>
    %500 = arith.mulf %495, %499 : vector<1x128xf32>
    %cst_171 = arith.constant 2.000000e+00 : f32
    %501 = vector.broadcast %cst_171 : f32 to vector<1x128xf32>
    %502 = arith.mulf %501, %500 : vector<1x128xf32>
    %503 = arith.index_cast %c9_i32 : i32 to index
    %c0_172 = arith.constant 0 : index
    %504 = vector.load %arg3[%503, %c0_172] : memref<16x128xf32, #tpu.memory_space<vmem>>, vector<1x128xf32>
    tpu.vector_store %arg3[%503, %c0_172], %502 {strides = array<i32>} : memref<16x128xf32, #tpu.memory_space<vmem>>, vector<1x128xf32>,
    %c10_i32 = arith.constant 10 : i32
    %505 = arith.index_cast %c10_i32 : i32 to index
    %c0_173 = arith.constant 0 : index
    %506 = vector.load %arg4[%505, %c0_173] : memref<16x128xf32, #tpu.memory_space<vmem>>, vector<1x128xf32>
    %507 = arith.mulf %4, %500 : vector<1x128xf32>
    %508 = arith.addf %506, %507 : vector<1x128xf32>
    %cst_174 = arith.constant 5.000000e-01 : f32
    %509 = vector.broadcast %cst_174 : f32 to vector<1x128xf32>
    %510 = arith.mulf %509, %508 : vector<1x128xf32>
    %511 = math.tanh %510 : vector<1x128xf32>
    %cst_175 = arith.constant 5.000000e-01 : f32
    %512 = vector.broadcast %cst_175 : f32 to vector<1x128xf32>
    %513 = arith.mulf %512, %511 : vector<1x128xf32>
    %cst_176 = arith.constant 5.000000e-01 : f32
    %514 = vector.broadcast %cst_176 : f32 to vector<1x128xf32>
    %515 = arith.addf %513, %514 : vector<1x128xf32>
    %516 = arith.index_cast %c10_i32 : i32 to index
    %c0_177 = arith.constant 0 : index
    %517 = vector.load %arg5[%516, %c0_177] : memref<16x128xf32, #tpu.memory_space<vmem>>, vector<1x128xf32>
    %518 = arith.mulf %5, %500 : vector<1x128xf32>
    %519 = arith.addf %517, %518 : vector<1x128xf32>
    %cst_178 = arith.constant 5.000000e-01 : f32
    %520 = vector.broadcast %cst_178 : f32 to vector<1x128xf32>
    %521 = arith.mulf %520, %519 : vector<1x128xf32>
    %522 = math.tanh %521 : vector<1x128xf32>
    %cst_179 = arith.constant 5.000000e-01 : f32
    %523 = vector.broadcast %cst_179 : f32 to vector<1x128xf32>
    %524 = arith.mulf %523, %522 : vector<1x128xf32>
    %cst_180 = arith.constant 5.000000e-01 : f32
    %525 = vector.broadcast %cst_180 : f32 to vector<1x128xf32>
    %526 = arith.addf %524, %525 : vector<1x128xf32>
    %527 = arith.index_cast %c10_i32 : i32 to index
    %c0_181 = arith.constant 0 : index
    %528 = vector.load %arg6[%527, %c0_181] : memref<16x128xf32, #tpu.memory_space<vmem>>, vector<1x128xf32>
    %529 = arith.mulf %6, %500 : vector<1x128xf32>
    %530 = arith.addf %528, %529 : vector<1x128xf32>
    %531 = math.tanh %530 : vector<1x128xf32>
    %532 = arith.index_cast %c10_i32 : i32 to index
    %c0_182 = arith.constant 0 : index
    %533 = vector.load %arg7[%532, %c0_182] : memref<16x128xf32, #tpu.memory_space<vmem>>, vector<1x128xf32>
    %534 = arith.mulf %7, %500 : vector<1x128xf32>
    %535 = arith.addf %533, %534 : vector<1x128xf32>
    %cst_183 = arith.constant 5.000000e-01 : f32
    %536 = vector.broadcast %cst_183 : f32 to vector<1x128xf32>
    %537 = arith.mulf %536, %535 : vector<1x128xf32>
    %538 = math.tanh %537 : vector<1x128xf32>
    %cst_184 = arith.constant 5.000000e-01 : f32
    %539 = vector.broadcast %cst_184 : f32 to vector<1x128xf32>
    %540 = arith.mulf %539, %538 : vector<1x128xf32>
    %cst_185 = arith.constant 5.000000e-01 : f32
    %541 = vector.broadcast %cst_185 : f32 to vector<1x128xf32>
    %542 = arith.addf %540, %541 : vector<1x128xf32>
    %543 = arith.mulf %526, %498 : vector<1x128xf32>
    %544 = arith.mulf %515, %531 : vector<1x128xf32>
    %545 = arith.addf %543, %544 : vector<1x128xf32>
    %546 = math.tanh %545 : vector<1x128xf32>
    %547 = arith.mulf %542, %546 : vector<1x128xf32>
    %cst_186 = arith.constant 2.000000e+00 : f32
    %548 = vector.broadcast %cst_186 : f32 to vector<1x128xf32>
    %549 = arith.mulf %548, %547 : vector<1x128xf32>
    %550 = arith.index_cast %c10_i32 : i32 to index
    %c0_187 = arith.constant 0 : index
    %551 = vector.load %arg3[%550, %c0_187] : memref<16x128xf32, #tpu.memory_space<vmem>>, vector<1x128xf32>
    tpu.vector_store %arg3[%550, %c0_187], %549 {strides = array<i32>} : memref<16x128xf32, #tpu.memory_space<vmem>>, vector<1x128xf32>,
    %c11_i32 = arith.constant 11 : i32
    %552 = arith.index_cast %c11_i32 : i32 to index
    %c0_188 = arith.constant 0 : index
    %553 = vector.load %arg4[%552, %c0_188] : memref<16x128xf32, #tpu.memory_space<vmem>>, vector<1x128xf32>
    %554 = arith.mulf %4, %547 : vector<1x128xf32>
    %555 = arith.addf %553, %554 : vector<1x128xf32>
    %cst_189 = arith.constant 5.000000e-01 : f32
    %556 = vector.broadcast %cst_189 : f32 to vector<1x128xf32>
    %557 = arith.mulf %556, %555 : vector<1x128xf32>
    %558 = math.tanh %557 : vector<1x128xf32>
    %cst_190 = arith.constant 5.000000e-01 : f32
    %559 = vector.broadcast %cst_190 : f32 to vector<1x128xf32>
    %560 = arith.mulf %559, %558 : vector<1x128xf32>
    %cst_191 = arith.constant 5.000000e-01 : f32
    %561 = vector.broadcast %cst_191 : f32 to vector<1x128xf32>
    %562 = arith.addf %560, %561 : vector<1x128xf32>
    %563 = arith.index_cast %c11_i32 : i32 to index
    %c0_192 = arith.constant 0 : index
    %564 = vector.load %arg5[%563, %c0_192] : memref<16x128xf32, #tpu.memory_space<vmem>>, vector<1x128xf32>
    %565 = arith.mulf %5, %547 : vector<1x128xf32>
    %566 = arith.addf %564, %565 : vector<1x128xf32>
    %cst_193 = arith.constant 5.000000e-01 : f32
    %567 = vector.broadcast %cst_193 : f32 to vector<1x128xf32>
    %568 = arith.mulf %567, %566 : vector<1x128xf32>
    %569 = math.tanh %568 : vector<1x128xf32>
    %cst_194 = arith.constant 5.000000e-01 : f32
    %570 = vector.broadcast %cst_194 : f32 to vector<1x128xf32>
    %571 = arith.mulf %570, %569 : vector<1x128xf32>
    %cst_195 = arith.constant 5.000000e-01 : f32
    %572 = vector.broadcast %cst_195 : f32 to vector<1x128xf32>
    %573 = arith.addf %571, %572 : vector<1x128xf32>
    %574 = arith.index_cast %c11_i32 : i32 to index
    %c0_196 = arith.constant 0 : index
    %575 = vector.load %arg6[%574, %c0_196] : memref<16x128xf32, #tpu.memory_space<vmem>>, vector<1x128xf32>
    %576 = arith.mulf %6, %547 : vector<1x128xf32>
    %577 = arith.addf %575, %576 : vector<1x128xf32>
    %578 = math.tanh %577 : vector<1x128xf32>
    %579 = arith.index_cast %c11_i32 : i32 to index
    %c0_197 = arith.constant 0 : index
    %580 = vector.load %arg7[%579, %c0_197] : memref<16x128xf32, #tpu.memory_space<vmem>>, vector<1x128xf32>
    %581 = arith.mulf %7, %547 : vector<1x128xf32>
    %582 = arith.addf %580, %581 : vector<1x128xf32>
    %cst_198 = arith.constant 5.000000e-01 : f32
    %583 = vector.broadcast %cst_198 : f32 to vector<1x128xf32>
    %584 = arith.mulf %583, %582 : vector<1x128xf32>
    %585 = math.tanh %584 : vector<1x128xf32>
    %cst_199 = arith.constant 5.000000e-01 : f32
    %586 = vector.broadcast %cst_199 : f32 to vector<1x128xf32>
    %587 = arith.mulf %586, %585 : vector<1x128xf32>
    %cst_200 = arith.constant 5.000000e-01 : f32
    %588 = vector.broadcast %cst_200 : f32 to vector<1x128xf32>
    %589 = arith.addf %587, %588 : vector<1x128xf32>
    %590 = arith.mulf %573, %545 : vector<1x128xf32>
    %591 = arith.mulf %562, %578 : vector<1x128xf32>
    %592 = arith.addf %590, %591 : vector<1x128xf32>
    %593 = math.tanh %592 : vector<1x128xf32>
    %594 = arith.mulf %589, %593 : vector<1x128xf32>
    %cst_201 = arith.constant 2.000000e+00 : f32
    %595 = vector.broadcast %cst_201 : f32 to vector<1x128xf32>
    %596 = arith.mulf %595, %594 : vector<1x128xf32>
    %597 = arith.index_cast %c11_i32 : i32 to index
    %c0_202 = arith.constant 0 : index
    %598 = vector.load %arg3[%597, %c0_202] : memref<16x128xf32, #tpu.memory_space<vmem>>, vector<1x128xf32>
    tpu.vector_store %arg3[%597, %c0_202], %596 {strides = array<i32>} : memref<16x128xf32, #tpu.memory_space<vmem>>, vector<1x128xf32>,
    %c12_i32 = arith.constant 12 : i32
    %599 = arith.index_cast %c12_i32 : i32 to index
    %c0_203 = arith.constant 0 : index
    %600 = vector.load %arg4[%599, %c0_203] : memref<16x128xf32, #tpu.memory_space<vmem>>, vector<1x128xf32>
    %601 = arith.mulf %4, %594 : vector<1x128xf32>
    %602 = arith.addf %600, %601 : vector<1x128xf32>
    %cst_204 = arith.constant 5.000000e-01 : f32
    %603 = vector.broadcast %cst_204 : f32 to vector<1x128xf32>
    %604 = arith.mulf %603, %602 : vector<1x128xf32>
    %605 = math.tanh %604 : vector<1x128xf32>
    %cst_205 = arith.constant 5.000000e-01 : f32
    %606 = vector.broadcast %cst_205 : f32 to vector<1x128xf32>
    %607 = arith.mulf %606, %605 : vector<1x128xf32>
    %cst_206 = arith.constant 5.000000e-01 : f32
    %608 = vector.broadcast %cst_206 : f32 to vector<1x128xf32>
    %609 = arith.addf %607, %608 : vector<1x128xf32>
    %610 = arith.index_cast %c12_i32 : i32 to index
    %c0_207 = arith.constant 0 : index
    %611 = vector.load %arg5[%610, %c0_207] : memref<16x128xf32, #tpu.memory_space<vmem>>, vector<1x128xf32>
    %612 = arith.mulf %5, %594 : vector<1x128xf32>
    %613 = arith.addf %611, %612 : vector<1x128xf32>
    %cst_208 = arith.constant 5.000000e-01 : f32
    %614 = vector.broadcast %cst_208 : f32 to vector<1x128xf32>
    %615 = arith.mulf %614, %613 : vector<1x128xf32>
    %616 = math.tanh %615 : vector<1x128xf32>
    %cst_209 = arith.constant 5.000000e-01 : f32
    %617 = vector.broadcast %cst_209 : f32 to vector<1x128xf32>
    %618 = arith.mulf %617, %616 : vector<1x128xf32>
    %cst_210 = arith.constant 5.000000e-01 : f32
    %619 = vector.broadcast %cst_210 : f32 to vector<1x128xf32>
    %620 = arith.addf %618, %619 : vector<1x128xf32>
    %621 = arith.index_cast %c12_i32 : i32 to index
    %c0_211 = arith.constant 0 : index
    %622 = vector.load %arg6[%621, %c0_211] : memref<16x128xf32, #tpu.memory_space<vmem>>, vector<1x128xf32>
    %623 = arith.mulf %6, %594 : vector<1x128xf32>
    %624 = arith.addf %622, %623 : vector<1x128xf32>
    %625 = math.tanh %624 : vector<1x128xf32>
    %626 = arith.index_cast %c12_i32 : i32 to index
    %c0_212 = arith.constant 0 : index
    %627 = vector.load %arg7[%626, %c0_212] : memref<16x128xf32, #tpu.memory_space<vmem>>, vector<1x128xf32>
    %628 = arith.mulf %7, %594 : vector<1x128xf32>
    %629 = arith.addf %627, %628 : vector<1x128xf32>
    %cst_213 = arith.constant 5.000000e-01 : f32
    %630 = vector.broadcast %cst_213 : f32 to vector<1x128xf32>
    %631 = arith.mulf %630, %629 : vector<1x128xf32>
    %632 = math.tanh %631 : vector<1x128xf32>
    %cst_214 = arith.constant 5.000000e-01 : f32
    %633 = vector.broadcast %cst_214 : f32 to vector<1x128xf32>
    %634 = arith.mulf %633, %632 : vector<1x128xf32>
    %cst_215 = arith.constant 5.000000e-01 : f32
    %635 = vector.broadcast %cst_215 : f32 to vector<1x128xf32>
    %636 = arith.addf %634, %635 : vector<1x128xf32>
    %637 = arith.mulf %620, %592 : vector<1x128xf32>
    %638 = arith.mulf %609, %625 : vector<1x128xf32>
    %639 = arith.addf %637, %638 : vector<1x128xf32>
    %640 = math.tanh %639 : vector<1x128xf32>
    %641 = arith.mulf %636, %640 : vector<1x128xf32>
    %cst_216 = arith.constant 2.000000e+00 : f32
    %642 = vector.broadcast %cst_216 : f32 to vector<1x128xf32>
    %643 = arith.mulf %642, %641 : vector<1x128xf32>
    %644 = arith.index_cast %c12_i32 : i32 to index
    %c0_217 = arith.constant 0 : index
    %645 = vector.load %arg3[%644, %c0_217] : memref<16x128xf32, #tpu.memory_space<vmem>>, vector<1x128xf32>
    tpu.vector_store %arg3[%644, %c0_217], %643 {strides = array<i32>} : memref<16x128xf32, #tpu.memory_space<vmem>>, vector<1x128xf32>,
    %c13_i32 = arith.constant 13 : i32
    %646 = arith.index_cast %c13_i32 : i32 to index
    %c0_218 = arith.constant 0 : index
    %647 = vector.load %arg4[%646, %c0_218] : memref<16x128xf32, #tpu.memory_space<vmem>>, vector<1x128xf32>
    %648 = arith.mulf %4, %641 : vector<1x128xf32>
    %649 = arith.addf %647, %648 : vector<1x128xf32>
    %cst_219 = arith.constant 5.000000e-01 : f32
    %650 = vector.broadcast %cst_219 : f32 to vector<1x128xf32>
    %651 = arith.mulf %650, %649 : vector<1x128xf32>
    %652 = math.tanh %651 : vector<1x128xf32>
    %cst_220 = arith.constant 5.000000e-01 : f32
    %653 = vector.broadcast %cst_220 : f32 to vector<1x128xf32>
    %654 = arith.mulf %653, %652 : vector<1x128xf32>
    %cst_221 = arith.constant 5.000000e-01 : f32
    %655 = vector.broadcast %cst_221 : f32 to vector<1x128xf32>
    %656 = arith.addf %654, %655 : vector<1x128xf32>
    %657 = arith.index_cast %c13_i32 : i32 to index
    %c0_222 = arith.constant 0 : index
    %658 = vector.load %arg5[%657, %c0_222] : memref<16x128xf32, #tpu.memory_space<vmem>>, vector<1x128xf32>
    %659 = arith.mulf %5, %641 : vector<1x128xf32>
    %660 = arith.addf %658, %659 : vector<1x128xf32>
    %cst_223 = arith.constant 5.000000e-01 : f32
    %661 = vector.broadcast %cst_223 : f32 to vector<1x128xf32>
    %662 = arith.mulf %661, %660 : vector<1x128xf32>
    %663 = math.tanh %662 : vector<1x128xf32>
    %cst_224 = arith.constant 5.000000e-01 : f32
    %664 = vector.broadcast %cst_224 : f32 to vector<1x128xf32>
    %665 = arith.mulf %664, %663 : vector<1x128xf32>
    %cst_225 = arith.constant 5.000000e-01 : f32
    %666 = vector.broadcast %cst_225 : f32 to vector<1x128xf32>
    %667 = arith.addf %665, %666 : vector<1x128xf32>
    %668 = arith.index_cast %c13_i32 : i32 to index
    %c0_226 = arith.constant 0 : index
    %669 = vector.load %arg6[%668, %c0_226] : memref<16x128xf32, #tpu.memory_space<vmem>>, vector<1x128xf32>
    %670 = arith.mulf %6, %641 : vector<1x128xf32>
    %671 = arith.addf %669, %670 : vector<1x128xf32>
    %672 = math.tanh %671 : vector<1x128xf32>
    %673 = arith.index_cast %c13_i32 : i32 to index
    %c0_227 = arith.constant 0 : index
    %674 = vector.load %arg7[%673, %c0_227] : memref<16x128xf32, #tpu.memory_space<vmem>>, vector<1x128xf32>
    %675 = arith.mulf %7, %641 : vector<1x128xf32>
    %676 = arith.addf %674, %675 : vector<1x128xf32>
    %cst_228 = arith.constant 5.000000e-01 : f32
    %677 = vector.broadcast %cst_228 : f32 to vector<1x128xf32>
    %678 = arith.mulf %677, %676 : vector<1x128xf32>
    %679 = math.tanh %678 : vector<1x128xf32>
    %cst_229 = arith.constant 5.000000e-01 : f32
    %680 = vector.broadcast %cst_229 : f32 to vector<1x128xf32>
    %681 = arith.mulf %680, %679 : vector<1x128xf32>
    %cst_230 = arith.constant 5.000000e-01 : f32
    %682 = vector.broadcast %cst_230 : f32 to vector<1x128xf32>
    %683 = arith.addf %681, %682 : vector<1x128xf32>
    %684 = arith.mulf %667, %639 : vector<1x128xf32>
    %685 = arith.mulf %656, %672 : vector<1x128xf32>
    %686 = arith.addf %684, %685 : vector<1x128xf32>
    %687 = math.tanh %686 : vector<1x128xf32>
    %688 = arith.mulf %683, %687 : vector<1x128xf32>
    %cst_231 = arith.constant 2.000000e+00 : f32
    %689 = vector.broadcast %cst_231 : f32 to vector<1x128xf32>
    %690 = arith.mulf %689, %688 : vector<1x128xf32>
    %691 = arith.index_cast %c13_i32 : i32 to index
    %c0_232 = arith.constant 0 : index
    %692 = vector.load %arg3[%691, %c0_232] : memref<16x128xf32, #tpu.memory_space<vmem>>, vector<1x128xf32>
    tpu.vector_store %arg3[%691, %c0_232], %690 {strides = array<i32>} : memref<16x128xf32, #tpu.memory_space<vmem>>, vector<1x128xf32>,
    %c14_i32 = arith.constant 14 : i32
    %693 = arith.index_cast %c14_i32 : i32 to index
    %c0_233 = arith.constant 0 : index
    %694 = vector.load %arg4[%693, %c0_233] : memref<16x128xf32, #tpu.memory_space<vmem>>, vector<1x128xf32>
    %695 = arith.mulf %4, %688 : vector<1x128xf32>
    %696 = arith.addf %694, %695 : vector<1x128xf32>
    %cst_234 = arith.constant 5.000000e-01 : f32
    %697 = vector.broadcast %cst_234 : f32 to vector<1x128xf32>
    %698 = arith.mulf %697, %696 : vector<1x128xf32>
    %699 = math.tanh %698 : vector<1x128xf32>
    %cst_235 = arith.constant 5.000000e-01 : f32
    %700 = vector.broadcast %cst_235 : f32 to vector<1x128xf32>
    %701 = arith.mulf %700, %699 : vector<1x128xf32>
    %cst_236 = arith.constant 5.000000e-01 : f32
    %702 = vector.broadcast %cst_236 : f32 to vector<1x128xf32>
    %703 = arith.addf %701, %702 : vector<1x128xf32>
    %704 = arith.index_cast %c14_i32 : i32 to index
    %c0_237 = arith.constant 0 : index
    %705 = vector.load %arg5[%704, %c0_237] : memref<16x128xf32, #tpu.memory_space<vmem>>, vector<1x128xf32>
    %706 = arith.mulf %5, %688 : vector<1x128xf32>
    %707 = arith.addf %705, %706 : vector<1x128xf32>
    %cst_238 = arith.constant 5.000000e-01 : f32
    %708 = vector.broadcast %cst_238 : f32 to vector<1x128xf32>
    %709 = arith.mulf %708, %707 : vector<1x128xf32>
    %710 = math.tanh %709 : vector<1x128xf32>
    %cst_239 = arith.constant 5.000000e-01 : f32
    %711 = vector.broadcast %cst_239 : f32 to vector<1x128xf32>
    %712 = arith.mulf %711, %710 : vector<1x128xf32>
    %cst_240 = arith.constant 5.000000e-01 : f32
    %713 = vector.broadcast %cst_240 : f32 to vector<1x128xf32>
    %714 = arith.addf %712, %713 : vector<1x128xf32>
    %715 = arith.index_cast %c14_i32 : i32 to index
    %c0_241 = arith.constant 0 : index
    %716 = vector.load %arg6[%715, %c0_241] : memref<16x128xf32, #tpu.memory_space<vmem>>, vector<1x128xf32>
    %717 = arith.mulf %6, %688 : vector<1x128xf32>
    %718 = arith.addf %716, %717 : vector<1x128xf32>
    %719 = math.tanh %718 : vector<1x128xf32>
    %720 = arith.index_cast %c14_i32 : i32 to index
    %c0_242 = arith.constant 0 : index
    %721 = vector.load %arg7[%720, %c0_242] : memref<16x128xf32, #tpu.memory_space<vmem>>, vector<1x128xf32>
    %722 = arith.mulf %7, %688 : vector<1x128xf32>
    %723 = arith.addf %721, %722 : vector<1x128xf32>
    %cst_243 = arith.constant 5.000000e-01 : f32
    %724 = vector.broadcast %cst_243 : f32 to vector<1x128xf32>
    %725 = arith.mulf %724, %723 : vector<1x128xf32>
    %726 = math.tanh %725 : vector<1x128xf32>
    %cst_244 = arith.constant 5.000000e-01 : f32
    %727 = vector.broadcast %cst_244 : f32 to vector<1x128xf32>
    %728 = arith.mulf %727, %726 : vector<1x128xf32>
    %cst_245 = arith.constant 5.000000e-01 : f32
    %729 = vector.broadcast %cst_245 : f32 to vector<1x128xf32>
    %730 = arith.addf %728, %729 : vector<1x128xf32>
    %731 = arith.mulf %714, %686 : vector<1x128xf32>
    %732 = arith.mulf %703, %719 : vector<1x128xf32>
    %733 = arith.addf %731, %732 : vector<1x128xf32>
    %734 = math.tanh %733 : vector<1x128xf32>
    %735 = arith.mulf %730, %734 : vector<1x128xf32>
    %cst_246 = arith.constant 2.000000e+00 : f32
    %736 = vector.broadcast %cst_246 : f32 to vector<1x128xf32>
    %737 = arith.mulf %736, %735 : vector<1x128xf32>
    %738 = arith.index_cast %c14_i32 : i32 to index
    %c0_247 = arith.constant 0 : index
    %739 = vector.load %arg3[%738, %c0_247] : memref<16x128xf32, #tpu.memory_space<vmem>>, vector<1x128xf32>
    tpu.vector_store %arg3[%738, %c0_247], %737 {strides = array<i32>} : memref<16x128xf32, #tpu.memory_space<vmem>>, vector<1x128xf32>,
    %c15_i32 = arith.constant 15 : i32
    %740 = arith.index_cast %c15_i32 : i32 to index
    %c0_248 = arith.constant 0 : index
    %741 = vector.load %arg4[%740, %c0_248] : memref<16x128xf32, #tpu.memory_space<vmem>>, vector<1x128xf32>
    %742 = arith.mulf %4, %735 : vector<1x128xf32>
    %743 = arith.addf %741, %742 : vector<1x128xf32>
    %cst_249 = arith.constant 5.000000e-01 : f32
    %744 = vector.broadcast %cst_249 : f32 to vector<1x128xf32>
    %745 = arith.mulf %744, %743 : vector<1x128xf32>
    %746 = math.tanh %745 : vector<1x128xf32>
    %cst_250 = arith.constant 5.000000e-01 : f32
    %747 = vector.broadcast %cst_250 : f32 to vector<1x128xf32>
    %748 = arith.mulf %747, %746 : vector<1x128xf32>
    %cst_251 = arith.constant 5.000000e-01 : f32
    %749 = vector.broadcast %cst_251 : f32 to vector<1x128xf32>
    %750 = arith.addf %748, %749 : vector<1x128xf32>
    %751 = arith.index_cast %c15_i32 : i32 to index
    %c0_252 = arith.constant 0 : index
    %752 = vector.load %arg5[%751, %c0_252] : memref<16x128xf32, #tpu.memory_space<vmem>>, vector<1x128xf32>
    %753 = arith.mulf %5, %735 : vector<1x128xf32>
    %754 = arith.addf %752, %753 : vector<1x128xf32>
    %cst_253 = arith.constant 5.000000e-01 : f32
    %755 = vector.broadcast %cst_253 : f32 to vector<1x128xf32>
    %756 = arith.mulf %755, %754 : vector<1x128xf32>
    %757 = math.tanh %756 : vector<1x128xf32>
    %cst_254 = arith.constant 5.000000e-01 : f32
    %758 = vector.broadcast %cst_254 : f32 to vector<1x128xf32>
    %759 = arith.mulf %758, %757 : vector<1x128xf32>
    %cst_255 = arith.constant 5.000000e-01 : f32
    %760 = vector.broadcast %cst_255 : f32 to vector<1x128xf32>
    %761 = arith.addf %759, %760 : vector<1x128xf32>
    %762 = arith.index_cast %c15_i32 : i32 to index
    %c0_256 = arith.constant 0 : index
    %763 = vector.load %arg6[%762, %c0_256] : memref<16x128xf32, #tpu.memory_space<vmem>>, vector<1x128xf32>
    %764 = arith.mulf %6, %735 : vector<1x128xf32>
    %765 = arith.addf %763, %764 : vector<1x128xf32>
    %766 = math.tanh %765 : vector<1x128xf32>
    %767 = arith.index_cast %c15_i32 : i32 to index
    %c0_257 = arith.constant 0 : index
    %768 = vector.load %arg7[%767, %c0_257] : memref<16x128xf32, #tpu.memory_space<vmem>>, vector<1x128xf32>
    %769 = arith.mulf %7, %735 : vector<1x128xf32>
    %770 = arith.addf %768, %769 : vector<1x128xf32>
    %cst_258 = arith.constant 5.000000e-01 : f32
    %771 = vector.broadcast %cst_258 : f32 to vector<1x128xf32>
    %772 = arith.mulf %771, %770 : vector<1x128xf32>
    %773 = math.tanh %772 : vector<1x128xf32>
    %cst_259 = arith.constant 5.000000e-01 : f32
    %774 = vector.broadcast %cst_259 : f32 to vector<1x128xf32>
    %775 = arith.mulf %774, %773 : vector<1x128xf32>
    %cst_260 = arith.constant 5.000000e-01 : f32
    %776 = vector.broadcast %cst_260 : f32 to vector<1x128xf32>
    %777 = arith.addf %775, %776 : vector<1x128xf32>
    %778 = arith.mulf %761, %733 : vector<1x128xf32>
    %779 = arith.mulf %750, %766 : vector<1x128xf32>
    %780 = arith.addf %778, %779 : vector<1x128xf32>
    %781 = math.tanh %780 : vector<1x128xf32>
    %782 = arith.mulf %777, %781 : vector<1x128xf32>
    %cst_261 = arith.constant 2.000000e+00 : f32
    %783 = vector.broadcast %cst_261 : f32 to vector<1x128xf32>
    %784 = arith.mulf %783, %782 : vector<1x128xf32>
    %785 = arith.index_cast %c15_i32 : i32 to index
    %c0_262 = arith.constant 0 : index
    %786 = vector.load %arg3[%785, %c0_262] : memref<16x128xf32, #tpu.memory_space<vmem>>, vector<1x128xf32>
    tpu.vector_store %arg3[%785, %c0_262], %784 {strides = array<i32>} : memref<16x128xf32, #tpu.memory_space<vmem>>, vector<1x128xf32>,
    %c16_i32 = arith.constant 16 : i32
    return
  }
  func.func @transform_0(%arg0: i32) -> (i32, i32) {
    %c0_i32 = arith.constant 0 : i32
    %c0_i32_0 = arith.constant 0 : i32
    return %c0_i32, %arg0 : i32, i32
  }
  func.func @transform_1(%arg0: i32) -> (i32, i32) {
    %c0_i32 = arith.constant 0 : i32
    %c0_i32_0 = arith.constant 0 : i32
    return %c0_i32, %arg0 : i32, i32
  }
  func.func @transform_2(%arg0: i32) -> (i32, i32) {
    %c0_i32 = arith.constant 0 : i32
    %c0_i32_0 = arith.constant 0 : i32
    return %c0_i32, %arg0 : i32, i32
  }
}

</mosaic_0001>

<bundles_post_ra>
// kernel: tpu_custom_call.1
= control target key start
LH: loop header
LB: loop body
LE: loop exit
PB: predicated region body
PF: predicated region fallthrough
CT: control target
= control target key end

     0   :  { %7 = vsyncpa [#allocation7], 0  ;;  %s1019_s0 = inlined_call_operand.hbm [shape: f32[16,128], index: 0, kind: input, shape index: {}]   ;;  %s1020_s1 = inlined_call_operand.hbm [shape: f32[16,128], index: 1, kind: input, shape index: {}]   ;;  %s1021_s2 = inlined_call_operand.hbm [shape: f32[16,128], index: 2, kind: output, shape index: {}]  }
   0x1   :  { %8 = vsyncpa [#allocation10], 0 }
   0x2   :  { %9 = vsyncpa [#allocation8], 0  ;;  %s885_s9 = smov [#allocation6]  }
   0x3   :  { %s15_s10 = sshll.u32 %s885_s9, 4  ;;  %s16_s10 = int_to_ptr.vmem [resolvable:$true] %s15_s10 }
   0x4   :  { %s827_s11 = scalar_lea.vmem %s16_s10, 256  ;;  %p832_p1 = scmp.lt.s32.totalorder %s16_s10, %s16_s10 }
   0x5   :  { %p828_p0 = scmp.ne.s32.totalorder %s16_s10, %s827_s11  ;;  %p833_p2 = scmp.lt.s32.totalorder %s827_s11, %s827_s11 }
   0x7   :  { %p834_p3 = por %p833_p2, %p832_p1 }
   0x9   :  { %p835_p4 = pnand %p834_p3, %p828_p0 }
   0xb   :  { %838 = shalt.err (!%p835_p4)
}
   0xc   :  { %s886_s12 = smov 128   ;;  %s887_s13 = smov 8  }
   0xd   :  { %21 = dma.hbm_to_vmem [thread:$0]  %s1019_s0, 256, %s16_s10, [#allocation7], %s886_s12, %s886_s12, %s887_s13  }
   0xe   :  { %s888_s16 = smov [#allocation9]  }
   0xf   :  { %s27_s17 = sshll.u32 %s888_s16, 4  ;;  %s28_s17 = int_to_ptr.vmem [resolvable:$true] %s27_s17 }
  0x10   :  { %s847_s18 = scalar_lea.vmem %s28_s17, 256  ;;  %p852_p6 = scmp.lt.s32.totalorder %s28_s17, %s28_s17 }
  0x11   :  { %p848_p5 = scmp.ne.s32.totalorder %s28_s17, %s847_s18  ;;  %p853_p7 = scmp.lt.s32.totalorder %s847_s18, %s847_s18 }
  0x13   :  { %p854_p8 = por %p853_p7, %p852_p6 }
  0x15   :  { %p855_p9 = pnand %p854_p8, %p848_p5 }
  0x17   :  { %858 = shalt.err (!%p855_p9)
}
  0x18   :  { %33 = dma.hbm_to_vmem [thread:$0]  %s1020_s1, 256, %s28_s17, [#allocation10], %s886_s12, %s886_s12, %s887_s13  }
  0x19   :  { %879 = dma.done.wait [#allocation7], 256  }
  0x1a   :  { %880 = vsyncadd [#allocation7], 4294967040 }
  0x1b   :  { %881 = dma.done.wait [#allocation10], 256  }
  0x1c   :  { %882 = vsyncadd [#allocation10], 4294967040  ;;  %v917_v0 = vld [vmem:[#allocation9] ss:$0 sm:$0xff]  ;;  %v919_v1 = vld [vmem:[#allocation9 + $0x8] ss:$0 sm:$0xff] }
  0x1d   :  { %v54_v2 = vld [vmem:[#allocation6] sm:$0xff]  ;;  %v922_v4 = vld [vmem:[#allocation9 + $0x1] ss:$0 sm:$0xff]  ;;  %v924_v5 = vld [vmem:[#allocation9 + $0x9] ss:$0 sm:$0xff]  ;;  %s889_s0 = smov [#allocation11]  }
  0x1e   :  { %v60_v3 = vmul.f32 %v917_v0, %v54_v2  ;;  %v926_v6 = vld [vmem:[#allocation9 + $0x2] ss:$0 sm:$0xff]  ;;  %v74_v7 = vmul.f32 %v922_v4, %v54_v2  ;;  %v929_v8 = vld [vmem:[#allocation9 + $0xa] ss:$0 sm:$0xff]  ;;  %v932_v10 = vld [vmem:[#allocation9 + $0x3] ss:$0 sm:$0xff] }
  0x1f   :  { %v88_v9 = vmul.f32 %v926_v6, %v54_v2  ;;  %v934_v11 = vld [vmem:[#allocation9 + $0xb] ss:$0 sm:$0xff]  ;;  %v102_v13 = vmul.f32 %v932_v10, %v54_v2  ;;  %v941_v17 = vld [vmem:[#allocation9 + $0x4] sm:$0x1]  ;;  %v52_v18 = vld [vmem:[#allocation9 + $0xc] sm:$0x1] }
  0x20   :  { %v66_v12 = vadd.f32 %v919_v1, %v60_v3  ;;  %v80_v14 = vadd.f32 %v924_v5, %v74_v7  ;;  %v943_v19 = vld [vmem:[#allocation9 + $0x5] sm:$0x1]  ;;  %v945_v20 = vld [vmem:[#allocation9 + $0x6] sm:$0x1]  ;;  %v113_v21 = vmul.f32 %v52_v18, %v941_v17  ;;  %v950_v29 = vld [vmem:[#allocation9 + $0x7] sm:$0x1] }
  0x21   :  { %v94_v15 = vadd.f32 %v929_v8, %v88_v9  ;;  %v108_v16 = vadd.f32 %v934_v11, %v102_v13  ;;  %v120_v22 = vmul.f32 %v52_v18, %v943_v19  ;;  %v127_v23 = vmul.f32 %v52_v18, %v945_v20  ;;  %v53_v42 = vld [vmem:[#allocation9 + $0xd] sm:$0x1]  ;;  %s629_s1 = sshll.u32 %s889_s0, 4  ;;  %s630_s1 = int_to_ptr.vmem [resolvable:$true] %s629_s1 }
  0x22   :  { %68 = vst [vmem:[#allocation2] sm:$0xff] %v66_v12  ;;  %82 = vst [vmem:[#allocation3] sm:$0xff] %v80_v14  ;;  %v131_v33 = vmul.f32 %v52_v18, %v950_v29  ;;  %s859_s21 = scalar_lea.vmem %s630_s1, 256  ;;  %p864_p11 = scmp.lt.s32.totalorder %s630_s1, %s630_s1 }
  0x23   :  { %96 = vst [vmem:[#allocation4] sm:$0xff] %v94_v15  ;;  %110 = vst [vmem:[#allocation5] sm:$0xff] %v108_v16  ;;  %p860_p10 = scmp.ne.s32.totalorder %s630_s1, %s859_s21  ;;  %p865_p12 = scmp.lt.s32.totalorder %s859_s21, %s859_s21 }
  0x25   :  { %p866_p13 = por %p865_p12, %p864_p11 }
  0x27   :  { %p867_p0 = pnand %p866_p13, %p860_p10 }
  0x29   :  { %v112_v24 = vld [vmem:[#allocation2] sm:$0x1]  ;;  %v119_v25 = vld [vmem:[#allocation3] sm:$0x1]  ;;  %v144_v56 = vld [vmem:[#allocation2 + $0x1] sm:$0x1] }
  0x2a   :  { %v126_v26 = vld [vmem:[#allocation4] sm:$0x1]  ;;  %v114_v27 = vadd.f32 %v113_v21, %v112_v24  ;;  %v121_v28 = vadd.f32 %v120_v22, %v119_v25  ;;  %v130_v34 = vld [vmem:[#allocation5] sm:$0x1]  ;;  %v151_v57 = vld [vmem:[#allocation3 + $0x1] sm:$0x1] }
  0x2b   :  { %v128_v31 = vadd.f32 %v127_v23, %v126_v26  ;;  %v132_v35 = vadd.f32 %v131_v33, %v130_v34  ;;  %v158_v63 = vld [vmem:[#allocation4 + $0x1] sm:$0x1]  ;;  %v162_v7 = vld [vmem:[#allocation5 + $0x1] sm:$0x1] }
  0x2c   :  { %v115_v30 = vmul.f32 0.5, %v114_v27  ;;  %v122_v32 = vmul.f32 0.5, %v121_v28 }
  0x2d   :  { %v133_v36 = vmul.f32 0.5, %v132_v35  ;;  %v176_v35 = vld [vmem:[#allocation2 + $0x2] sm:$0x1] }
  0x2e   :  { %655 = vtanh.f32 %v115_v30 }
  0x2f   :  { %657 = vtanh.f32 %v122_v32 }
  0x30   :  { %659 = vtanh.f32 %v128_v31 }
  0x31   :  { %661 = vtanh.f32 %v133_v36  ;;  %v183_v36 = vld [vmem:[#allocation3 + $0x2] sm:$0x1] }
  0x3b   :  { %v656_v37 = vpop.eup %655 }
  0x3c   :  { %v658_v38 = vpop.eup %657  ;;  %v117_v39 = vmul.f32 0.5, %v656_v37 }
  0x3d   :  { %v660_v40 = vpop.eup %659  ;;  %v124_v41 = vmul.f32 0.5, %v658_v38 }
  0x3e   :  { %v118_v43 = vadd.f32 0.5, %v117_v39  ;;  %v662_v48 = vpop.eup %661 }
  0x3f   :  { %v125_v44 = vadd.f32 0.5, %v124_v41  ;;  %v135_v49 = vmul.f32 0.5, %v662_v48 }
  0x40   :  { %v138_v45 = vmul.f32 %v660_v40, %v118_v43 }
  0x41   :  { %v137_v46 = vmul.f32 %v125_v44, %v53_v42  ;;  %v136_v50 = vadd.f32 0.5, %v135_v49  ;;  %v190_v42 = vld [vmem:[#allocation4 + $0x2] sm:$0x1] }
  0x43   :  { %v139_v47 = vadd.f32 %v138_v45, %v137_v46  ;;  %v194_v45 = vld [vmem:[#allocation5 + $0x2] sm:$0x1] }
  0x45   :  { %663 = vtanh.f32 %v139_v47 }
  0x52   :  { %v664_v51 = vpop.eup %663 }
  0x53   :  { %v141_v52 = vmul.f32 %v664_v51, %v136_v50 }
  0x55   :  { %v142_v53 = vmul.f32 2.0, %v141_v52  ;;  %v145_v54 = vmul.f32 %v141_v52, %v941_v17  ;;  %v152_v55 = vmul.f32 %v141_v52, %v943_v19  ;;  %v159_v60 = vmul.f32 %v141_v52, %v945_v20 }
  0x56   :  { %v163_v3 = vmul.f32 %v141_v52, %v950_v29 }
  0x57   :  { %143 = vst [vmem:[#allocation11] sm:$0x1] %v142_v53  ;;  %v146_v58 = vadd.f32 %v145_v54, %v144_v56  ;;  %v153_v59 = vadd.f32 %v152_v55, %v151_v57  ;;  %v160_v2 = vadd.f32 %v159_v60, %v158_v63 }
  0x58   :  { %v164_v9 = vadd.f32 %v163_v3, %v162_v7  ;;  %v208_v7 = vld [vmem:[#allocation2 + $0x3] sm:$0x1] }
  0x59   :  { %v147_v61 = vmul.f32 0.5, %v146_v58  ;;  %v154_v62 = vmul.f32 0.5, %v153_v59 }
  0x5a   :  { %v165_v12 = vmul.f32 0.5, %v164_v9  ;;  %v215_v9 = vld [vmem:[#allocation3 + $0x3] sm:$0x1] }
  0x5b   :  { %665 = vtanh.f32 %v147_v61 }
  0x5c   :  { %667 = vtanh.f32 %v154_v62 }
  0x5d   :  { %669 = vtanh.f32 %v160_v2 }
  0x5e   :  { %671 = vtanh.f32 %v165_v12 }
  0x68   :  { %v666_v13 = vpop.eup %665 }
  0x69   :  { %v668_v14 = vpop.eup %667  ;;  %v149_v15 = vmul.f32 0.5, %v666_v13 }
  0x6a   :  { %v156_v16 = vmul.f32 0.5, %v668_v14  ;;  %v670_v21 = vpop.eup %669 }
  0x6b   :  { %v150_v18 = vadd.f32 0.5, %v149_v15  ;;  %v672_v26 = vpop.eup %671 }
  0x6c   :  { %v157_v22 = vadd.f32 0.5, %v156_v16  ;;  %v167_v27 = vmul.f32 0.5, %v672_v26 }
  0x6d   :  { %v170_v23 = vmul.f32 %v670_v21, %v150_v18  ;;  %v222_v18 = vld [vmem:[#allocation4 + $0x3] sm:$0x1] }
  0x6e   :  { %v169_v24 = vmul.f32 %v157_v22, %v139_v47  ;;  %v168_v28 = vadd.f32 0.5, %v167_v27 }
  0x70   :  { %v171_v25 = vadd.f32 %v170_v23, %v169_v24  ;;  %v226_v23 = vld [vmem:[#allocation5 + $0x3] sm:$0x1] }
  0x72   :  { %673 = vtanh.f32 %v171_v25 }
  0x7f   :  { %v674_v30 = vpop.eup %673 }
  0x80   :  { %v173_v31 = vmul.f32 %v674_v30, %v168_v28 }
  0x82   :  { %v174_v32 = vmul.f32 2.0, %v173_v31  ;;  %v177_v33 = vmul.f32 %v173_v31, %v941_v17  ;;  %v184_v34 = vmul.f32 %v173_v31, %v943_v19  ;;  %v191_v39 = vmul.f32 %v173_v31, %v945_v20 }
  0x83   :  { %v195_v44 = vmul.f32 %v173_v31, %v950_v29 }
  0x84   :  { %175 = vst [vmem:[#allocation11 + $0x1] sm:$0x1] %v174_v32  ;;  %v178_v37 = vadd.f32 %v177_v33, %v176_v35  ;;  %v185_v38 = vadd.f32 %v184_v34, %v183_v36  ;;  %v192_v43 = vadd.f32 %v191_v39, %v190_v42 }
  0x85   :  { %v196_v46 = vadd.f32 %v195_v44, %v194_v45  ;;  %v240_v45 = vld [vmem:[#allocation2 + $0x4] sm:$0x1] }
  0x86   :  { %v179_v40 = vmul.f32 0.5, %v178_v37  ;;  %v186_v41 = vmul.f32 0.5, %v185_v38 }
  0x87   :  { %v197_v47 = vmul.f32 0.5, %v196_v46  ;;  %v247_v46 = vld [vmem:[#allocation3 + $0x4] sm:$0x1] }
  0x88   :  { %675 = vtanh.f32 %v179_v40 }
  0x89   :  { %677 = vtanh.f32 %v186_v41 }
  0x8a   :  { %679 = vtanh.f32 %v192_v43 }
  0x8b   :  { %681 = vtanh.f32 %v197_v47 }
  0x95   :  { %v676_v48 = vpop.eup %675 }
  0x96   :  { %v678_v49 = vpop.eup %677  ;;  %v181_v50 = vmul.f32 0.5, %v676_v48 }
  0x97   :  { %v188_v51 = vmul.f32 0.5, %v678_v49  ;;  %v680_v53 = vpop.eup %679 }
  0x98   :  { %v182_v52 = vadd.f32 0.5, %v181_v50  ;;  %v682_v58 = vpop.eup %681 }
  0x99   :  { %v189_v54 = vadd.f32 0.5, %v188_v51  ;;  %v199_v59 = vmul.f32 0.5, %v682_v58 }
  0x9a   :  { %v202_v55 = vmul.f32 %v680_v53, %v182_v52  ;;  %v254_v52 = vld [vmem:[#allocation4 + $0x4] sm:$0x1] }
  0x9b   :  { %v201_v56 = vmul.f32 %v189_v54, %v171_v25  ;;  %v200_v60 = vadd.f32 0.5, %v199_v59 }
  0x9d   :  { %v203_v57 = vadd.f32 %v202_v55, %v201_v56  ;;  %v258_v55 = vld [vmem:[#allocation5 + $0x4] sm:$0x1] }
  0x9f   :  { %683 = vtanh.f32 %v203_v57 }
  0xac   :  { %v684_v61 = vpop.eup %683 }
  0xad   :  { %v205_v62 = vmul.f32 %v684_v61, %v200_v60 }
  0xaf   :  { %v206_v63 = vmul.f32 2.0, %v205_v62  ;;  %v209_v2 = vmul.f32 %v205_v62, %v941_v17  ;;  %v216_v3 = vmul.f32 %v205_v62, %v943_v19  ;;  %v223_v14 = vmul.f32 %v205_v62, %v945_v20 }
  0xb0   :  { %v227_v22 = vmul.f32 %v205_v62, %v950_v29 }
  0xb1   :  { %207 = vst [vmem:[#allocation11 + $0x2] sm:$0x1] %v206_v63  ;;  %v210_v12 = vadd.f32 %v209_v2, %v208_v7  ;;  %v217_v13 = vadd.f32 %v216_v3, %v215_v9  ;;  %v224_v21 = vadd.f32 %v223_v14, %v222_v18 }
  0xb2   :  { %v228_v24 = vadd.f32 %v227_v22, %v226_v23 }
  0xb3   :  { %v211_v15 = vmul.f32 0.5, %v210_v12  ;;  %v218_v16 = vmul.f32 0.5, %v217_v13  ;;  %v55_v12 = vld [vmem:[#allocation6 + $0x8] sm:$0xff] }
  0xb4   :  { %v229_v25 = vmul.f32 0.5, %v228_v24  ;;  %v61_v13 = vmul.f32 %v917_v0, %v55_v12  ;;  %v75_v14 = vmul.f32 %v922_v4, %v55_v12 }
  0xb5   :  { %685 = vtanh.f32 %v211_v15  ;;  %v89_v15 = vmul.f32 %v926_v6, %v55_v12 }
  0xb6   :  { %687 = vtanh.f32 %v218_v16  ;;  %v103_v16 = vmul.f32 %v932_v10, %v55_v12  ;;  %v67_v18 = vadd.f32 %v919_v1, %v61_v13 }
  0xb7   :  { %689 = vtanh.f32 %v224_v21  ;;  %v81_v21 = vadd.f32 %v924_v5, %v75_v14  ;;  %v95_v22 = vadd.f32 %v929_v8, %v89_v15  ;;  %v279_v5 = vld [vmem:[#allocation3 + $0x5] sm:$0x1] }
  0xb8   :  { %691 = vtanh.f32 %v229_v25  ;;  %v109_v23 = vadd.f32 %v934_v11, %v103_v16  ;;  %69 = vst [vmem:[#allocation2 + $0x8] sm:$0xff] %v67_v18 }
  0xb9   :  { %83 = vst [vmem:[#allocation3 + $0x8] sm:$0xff] %v81_v21  ;;  %97 = vst [vmem:[#allocation4 + $0x8] sm:$0xff] %v95_v22 }
  0xba   :  { %111 = vst [vmem:[#allocation5 + $0x8] sm:$0xff] %v109_v23 }
  0xc2   :  { %v686_v26 = vpop.eup %685 }
  0xc3   :  { %v688_v27 = vpop.eup %687  ;;  %v213_v28 = vmul.f32 0.5, %v686_v26 }
  0xc4   :  { %v220_v30 = vmul.f32 0.5, %v688_v27  ;;  %v690_v32 = vpop.eup %689  ;;  %v272_v27 = vld [vmem:[#allocation2 + $0x5] sm:$0x1] }
  0xc5   :  { %v214_v31 = vadd.f32 0.5, %v213_v28  ;;  %v692_v37 = vpop.eup %691 }
  0xc6   :  { %v221_v33 = vadd.f32 0.5, %v220_v30  ;;  %v231_v38 = vmul.f32 0.5, %v692_v37 }
  0xc7   :  { %v234_v34 = vmul.f32 %v690_v32, %v214_v31  ;;  %v286_v32 = vld [vmem:[#allocation4 + $0x5] sm:$0x1] }
  0xc8   :  { %v233_v35 = vmul.f32 %v221_v33, %v203_v57  ;;  %v232_v39 = vadd.f32 0.5, %v231_v38 }
  0xca   :  { %v235_v36 = vadd.f32 %v234_v34, %v233_v35  ;;  %v290_v35 = vld [vmem:[#allocation5 + $0x5] sm:$0x1] }
  0xcc   :  { %693 = vtanh.f32 %v235_v36 }
  0xd9   :  { %v694_v40 = vpop.eup %693 }
  0xda   :  { %v237_v41 = vmul.f32 %v694_v40, %v232_v39 }
  0xdc   :  { %v238_v42 = vmul.f32 2.0, %v237_v41  ;;  %v241_v43 = vmul.f32 %v237_v41, %v941_v17  ;;  %v248_v44 = vmul.f32 %v237_v41, %v943_v19  ;;  %v255_v49 = vmul.f32 %v237_v41, %v945_v20 }
  0xdd   :  { %v259_v54 = vmul.f32 %v237_v41, %v950_v29 }
  0xde   :  { %239 = vst [vmem:[#allocation11 + $0x3] sm:$0x1] %v238_v42  ;;  %v242_v47 = vadd.f32 %v241_v43, %v240_v45  ;;  %v249_v48 = vadd.f32 %v248_v44, %v247_v46  ;;  %v256_v53 = vadd.f32 %v255_v49, %v254_v52 }
  0xdf   :  { %v260_v56 = vadd.f32 %v259_v54, %v258_v55 }
  0xe0   :  { %v243_v50 = vmul.f32 0.5, %v242_v47  ;;  %v250_v51 = vmul.f32 0.5, %v249_v48 }
  0xe1   :  { %v261_v57 = vmul.f32 0.5, %v260_v56  ;;  %v304_v56 = vld [vmem:[#allocation2 + $0x6] sm:$0x1] }
  0xe2   :  { %695 = vtanh.f32 %v243_v50 }
  0xe3   :  { %697 = vtanh.f32 %v250_v51 }
  0xe4   :  { %699 = vtanh.f32 %v256_v53 }
  0xe5   :  { %701 = vtanh.f32 %v261_v57  ;;  %v311_v57 = vld [vmem:[#allocation3 + $0x6] sm:$0x1] }
  0xef   :  { %v696_v58 = vpop.eup %695 }
  0xf0   :  { %v698_v59 = vpop.eup %697  ;;  %v245_v60 = vmul.f32 0.5, %v696_v58 }
  0xf1   :  { %v252_v61 = vmul.f32 0.5, %v698_v59  ;;  %v700_v63 = vpop.eup %699 }
  0xf2   :  { %v246_v62 = vadd.f32 0.5, %v245_v60  ;;  %v702_v24 = vpop.eup %701 }
  0xf3   :  { %v253_v2 = vadd.f32 0.5, %v252_v61  ;;  %v263_v0 = vmul.f32 0.5, %v702_v24 }
  0xf4   :  { %v266_v3 = vmul.f32 %v700_v63, %v246_v62  ;;  %v318_v63 = vld [vmem:[#allocation4 + $0x6] sm:$0x1] }
  0xf5   :  { %v265_v7 = vmul.f32 %v253_v2, %v235_v36  ;;  %v264_v25 = vadd.f32 0.5, %v263_v0 }
  0xf7   :  { %v267_v9 = vadd.f32 %v266_v3, %v265_v7  ;;  %v322_v7 = vld [vmem:[#allocation5 + $0x6] sm:$0x1] }
  0xf9   :  { %703 = vtanh.f32 %v267_v9 }
 0x106   :  { %v704_v4 = vpop.eup %703 }
 0x107   :  { %v269_v26 = vmul.f32 %v704_v4, %v264_v25 }
 0x109   :  { %v270_v6 = vmul.f32 2.0, %v269_v26  ;;  %v273_v10 = vmul.f32 %v269_v26, %v941_v17  ;;  %v280_v1 = vmul.f32 %v269_v26, %v943_v19  ;;  %v287_v11 = vmul.f32 %v269_v26, %v945_v20 }
 0x10a   :  { %v291_v34 = vmul.f32 %v269_v26, %v950_v29 }
 0x10b   :  { %271 = vst [vmem:[#allocation11 + $0x4] sm:$0x1] %v270_v6  ;;  %v274_v8 = vadd.f32 %v273_v10, %v272_v27  ;;  %v281_v28 = vadd.f32 %v280_v1, %v279_v5  ;;  %v288_v33 = vadd.f32 %v287_v11, %v286_v32 }
 0x10c   :  { %v292_v36 = vadd.f32 %v291_v34, %v290_v35  ;;  %v350_v34 = vld [vmem:[#allocation4 + $0x7] sm:$0x1] }
 0x10d   :  { %v275_v30 = vmul.f32 0.5, %v274_v8  ;;  %v282_v31 = vmul.f32 0.5, %v281_v28  ;;  %v336_v8 = vld [vmem:[#allocation2 + $0x7] sm:$0x1]  ;;  %v343_v28 = vld [vmem:[#allocation3 + $0x7] sm:$0x1] }
 0x10e   :  { %v293_v37 = vmul.f32 0.5, %v292_v36 }
 0x10f   :  { %705 = vtanh.f32 %v275_v30 }
 0x110   :  { %707 = vtanh.f32 %v282_v31 }
 0x111   :  { %709 = vtanh.f32 %v288_v33 }
 0x112   :  { %711 = vtanh.f32 %v293_v37  ;;  %v354_v37 = vld [vmem:[#allocation5 + $0x7] sm:$0x1] }
 0x11c   :  { %v706_v38 = vpop.eup %705 }
 0x11d   :  { %v708_v39 = vpop.eup %707  ;;  %v277_v40 = vmul.f32 0.5, %v706_v38 }
 0x11e   :  { %v284_v41 = vmul.f32 0.5, %v708_v39  ;;  %v710_v43 = vpop.eup %709 }
 0x11f   :  { %v278_v42 = vadd.f32 0.5, %v277_v40  ;;  %v712_v48 = vpop.eup %711 }
 0x120   :  { %v285_v44 = vadd.f32 0.5, %v284_v41  ;;  %v295_v49 = vmul.f32 0.5, %v712_v48 }
 0x121   :  { %v298_v45 = vmul.f32 %v710_v43, %v278_v42 }
 0x122   :  { %v297_v46 = vmul.f32 %v285_v44, %v267_v9  ;;  %v296_v50 = vadd.f32 0.5, %v295_v49 }
 0x124   :  { %v299_v47 = vadd.f32 %v298_v45, %v297_v46 }
 0x126   :  { %713 = vtanh.f32 %v299_v47 }
 0x133   :  { %v714_v51 = vpop.eup %713 }
 0x134   :  { %v301_v52 = vmul.f32 %v714_v51, %v296_v50 }
 0x136   :  { %v302_v53 = vmul.f32 2.0, %v301_v52  ;;  %v305_v54 = vmul.f32 %v301_v52, %v941_v17  ;;  %v312_v55 = vmul.f32 %v301_v52, %v943_v19  ;;  %v319_v60 = vmul.f32 %v301_v52, %v945_v20 }
 0x137   :  { %v323_v3 = vmul.f32 %v301_v52, %v950_v29 }
 0x138   :  { %303 = vst [vmem:[#allocation11 + $0x5] sm:$0x1] %v302_v53  ;;  %v306_v58 = vadd.f32 %v305_v54, %v304_v56  ;;  %v313_v59 = vadd.f32 %v312_v55, %v311_v57  ;;  %v320_v2 = vadd.f32 %v319_v60, %v318_v63  ;;  %v368_v55 = vld [vmem:[#allocation2 + $0x8] sm:$0x1]  ;;  %v375_v56 = vld [vmem:[#allocation3 + $0x8] sm:$0x1] }
 0x139   :  { %v324_v9 = vadd.f32 %v323_v3, %v322_v7  ;;  %v382_v63 = vld [vmem:[#allocation4 + $0x8] sm:$0x1] }
 0x13a   :  { %v307_v61 = vmul.f32 0.5, %v306_v58  ;;  %v314_v62 = vmul.f32 0.5, %v313_v59 }
 0x13b   :  { %v325_v12 = vmul.f32 0.5, %v324_v9 }
 0x13c   :  { %715 = vtanh.f32 %v307_v61 }
 0x13d   :  { %717 = vtanh.f32 %v314_v62 }
 0x13e   :  { %719 = vtanh.f32 %v320_v2 }
 0x13f   :  { %721 = vtanh.f32 %v325_v12  ;;  %v386_v12 = vld [vmem:[#allocation5 + $0x8] sm:$0x1] }
 0x149   :  { %v716_v13 = vpop.eup %715 }
 0x14a   :  { %v718_v14 = vpop.eup %717  ;;  %v309_v15 = vmul.f32 0.5, %v716_v13 }
 0x14b   :  { %v316_v16 = vmul.f32 0.5, %v718_v14  ;;  %v720_v21 = vpop.eup %719 }
 0x14c   :  { %v310_v18 = vadd.f32 0.5, %v309_v15  ;;  %v722_v25 = vpop.eup %721 }
 0x14d   :  { %v317_v22 = vadd.f32 0.5, %v316_v16  ;;  %v327_v4 = vmul.f32 0.5, %v722_v25 }
 0x14e   :  { %v330_v23 = vmul.f32 %v720_v21, %v310_v18 }
 0x14f   :  { %v329_v24 = vmul.f32 %v317_v22, %v299_v47  ;;  %v328_v26 = vadd.f32 0.5, %v327_v4 }
 0x151   :  { %v331_v0 = vadd.f32 %v330_v23, %v329_v24 }
 0x153   :  { %723 = vtanh.f32 %v331_v0 }
 0x160   :  { %v724_v6 = vpop.eup %723 }
 0x161   :  { %v333_v10 = vmul.f32 %v724_v6, %v328_v26 }
 0x163   :  { %v334_v1 = vmul.f32 2.0, %v333_v10  ;;  %v337_v27 = vmul.f32 %v333_v10, %v941_v17  ;;  %v344_v5 = vmul.f32 %v333_v10, %v943_v19  ;;  %v351_v31 = vmul.f32 %v333_v10, %v945_v20 }
 0x164   :  { %v355_v36 = vmul.f32 %v333_v10, %v950_v29 }
 0x165   :  { %335 = vst [vmem:[#allocation11 + $0x6] sm:$0x1] %v334_v1  ;;  %v338_v11 = vadd.f32 %v337_v27, %v336_v8  ;;  %v345_v30 = vadd.f32 %v344_v5, %v343_v28  ;;  %v352_v35 = vadd.f32 %v351_v31, %v350_v34 }
 0x166   :  { %v356_v38 = vadd.f32 %v355_v36, %v354_v37  ;;  %v414_v36 = vld [vmem:[#allocation4 + $0x9] sm:$0x1] }
 0x167   :  { %v339_v32 = vmul.f32 0.5, %v338_v11  ;;  %v346_v33 = vmul.f32 0.5, %v345_v30  ;;  %v400_v11 = vld [vmem:[#allocation2 + $0x9] sm:$0x1]  ;;  %v407_v30 = vld [vmem:[#allocation3 + $0x9] sm:$0x1] }
 0x168   :  { %v357_v39 = vmul.f32 0.5, %v356_v38 }
 0x169   :  { %725 = vtanh.f32 %v339_v32 }
 0x16a   :  { %727 = vtanh.f32 %v346_v33 }
 0x16b   :  { %729 = vtanh.f32 %v352_v35 }
 0x16c   :  { %731 = vtanh.f32 %v357_v39  ;;  %v418_v39 = vld [vmem:[#allocation5 + $0x9] sm:$0x1] }
 0x176   :  { %v726_v40 = vpop.eup %725 }
 0x177   :  { %v728_v41 = vpop.eup %727  ;;  %v341_v42 = vmul.f32 0.5, %v726_v40 }
 0x178   :  { %v348_v43 = vmul.f32 0.5, %v728_v41  ;;  %v730_v45 = vpop.eup %729 }
 0x179   :  { %v342_v44 = vadd.f32 0.5, %v341_v42  ;;  %v732_v50 = vpop.eup %731 }
 0x17a   :  { %v349_v46 = vadd.f32 0.5, %v348_v43  ;;  %v359_v51 = vmul.f32 0.5, %v732_v50 }
 0x17b   :  { %v362_v47 = vmul.f32 %v730_v45, %v342_v44 }
 0x17c   :  { %v361_v48 = vmul.f32 %v349_v46, %v331_v0  ;;  %v360_v52 = vadd.f32 0.5, %v359_v51 }
 0x17e   :  { %v363_v49 = vadd.f32 %v362_v47, %v361_v48 }
 0x180   :  { %733 = vtanh.f32 %v363_v49 }
 0x18d   :  { %v734_v53 = vpop.eup %733 }
 0x18e   :  { %v365_v54 = vmul.f32 %v734_v53, %v360_v52 }
 0x190   :  { %v366_v57 = vmul.f32 2.0, %v365_v54  ;;  %v369_v58 = vmul.f32 %v365_v54, %v941_v17  ;;  %v376_v59 = vmul.f32 %v365_v54, %v943_v19  ;;  %v383_v62 = vmul.f32 %v365_v54, %v945_v20 }
 0x191   :  { %v387_v9 = vmul.f32 %v365_v54, %v950_v29 }
 0x192   :  { %367 = vst [vmem:[#allocation11 + $0x7] sm:$0x1] %v366_v57  ;;  %v370_v60 = vadd.f32 %v369_v58, %v368_v55  ;;  %v377_v61 = vadd.f32 %v376_v59, %v375_v56  ;;  %v384_v7 = vadd.f32 %v383_v62, %v382_v63 }
 0x193   :  { %v388_v13 = vadd.f32 %v387_v9, %v386_v12  ;;  %v446_v9 = vld [vmem:[#allocation4 + $0xa] sm:$0x1] }
 0x194   :  { %v371_v2 = vmul.f32 0.5, %v370_v60  ;;  %v378_v3 = vmul.f32 0.5, %v377_v61  ;;  %v432_v60 = vld [vmem:[#allocation2 + $0xa] sm:$0x1]  ;;  %v439_v61 = vld [vmem:[#allocation3 + $0xa] sm:$0x1] }
 0x195   :  { %v389_v14 = vmul.f32 0.5, %v388_v13 }
 0x196   :  { %735 = vtanh.f32 %v371_v2 }
 0x197   :  { %737 = vtanh.f32 %v378_v3 }
 0x198   :  { %739 = vtanh.f32 %v384_v7 }
 0x199   :  { %741 = vtanh.f32 %v389_v14  ;;  %v450_v14 = vld [vmem:[#allocation5 + $0xa] sm:$0x1] }
 0x1a3   :  { %v736_v15 = vpop.eup %735 }
 0x1a4   :  { %v738_v16 = vpop.eup %737  ;;  %v373_v18 = vmul.f32 0.5, %v736_v15 }
 0x1a5   :  { %v380_v21 = vmul.f32 0.5, %v738_v16  ;;  %v740_v23 = vpop.eup %739 }
 0x1a6   :  { %v374_v22 = vadd.f32 0.5, %v373_v18  ;;  %v742_v26 = vpop.eup %741 }
 0x1a7   :  { %v381_v24 = vadd.f32 0.5, %v380_v21  ;;  %v391_v6 = vmul.f32 0.5, %v742_v26 }
 0x1a8   :  { %v394_v0 = vmul.f32 %v740_v23, %v374_v22 }
 0x1a9   :  { %v393_v25 = vmul.f32 %v381_v24, %v363_v49  ;;  %v392_v10 = vadd.f32 0.5, %v391_v6 }
 0x1ab   :  { %v395_v4 = vadd.f32 %v394_v0, %v393_v25 }
 0x1ad   :  { %743 = vtanh.f32 %v395_v4 }
 0x1ba   :  { %v744_v1 = vpop.eup %743 }
 0x1bb   :  { %v397_v27 = vmul.f32 %v744_v1, %v392_v10 }
 0x1bd   :  { %v398_v5 = vmul.f32 2.0, %v397_v27  ;;  %v401_v8 = vmul.f32 %v397_v27, %v941_v17  ;;  %v408_v28 = vmul.f32 %v397_v27, %v943_v19  ;;  %v415_v33 = vmul.f32 %v397_v27, %v945_v20 }
 0x1be   :  { %v419_v38 = vmul.f32 %v397_v27, %v950_v29 }
 0x1bf   :  { %399 = vst [vmem:[#allocation11 + $0x8] sm:$0x1] %v398_v5  ;;  %v402_v31 = vadd.f32 %v401_v8, %v400_v11  ;;  %v409_v32 = vadd.f32 %v408_v28, %v407_v30  ;;  %v416_v37 = vadd.f32 %v415_v33, %v414_v36 }
 0x1c0   :  { %v420_v40 = vadd.f32 %v419_v38, %v418_v39  ;;  %v478_v38 = vld [vmem:[#allocation4 + $0xb] sm:$0x1] }
 0x1c1   :  { %v403_v34 = vmul.f32 0.5, %v402_v31  ;;  %v410_v35 = vmul.f32 0.5, %v409_v32  ;;  %v464_v31 = vld [vmem:[#allocation2 + $0xb] sm:$0x1]  ;;  %v471_v32 = vld [vmem:[#allocation3 + $0xb] sm:$0x1] }
 0x1c2   :  { %v421_v41 = vmul.f32 0.5, %v420_v40 }
 0x1c3   :  { %745 = vtanh.f32 %v403_v34 }
 0x1c4   :  { %747 = vtanh.f32 %v410_v35 }
 0x1c5   :  { %749 = vtanh.f32 %v416_v37 }
 0x1c6   :  { %751 = vtanh.f32 %v421_v41  ;;  %v482_v41 = vld [vmem:[#allocation5 + $0xb] sm:$0x1] }
 0x1d0   :  { %v746_v42 = vpop.eup %745 }
 0x1d1   :  { %v748_v43 = vpop.eup %747  ;;  %v405_v44 = vmul.f32 0.5, %v746_v42 }
 0x1d2   :  { %v412_v45 = vmul.f32 0.5, %v748_v43  ;;  %v750_v47 = vpop.eup %749 }
 0x1d3   :  { %v406_v46 = vadd.f32 0.5, %v405_v44  ;;  %v752_v52 = vpop.eup %751 }
 0x1d4   :  { %v413_v48 = vadd.f32 0.5, %v412_v45  ;;  %v423_v53 = vmul.f32 0.5, %v752_v52 }
 0x1d5   :  { %v426_v49 = vmul.f32 %v750_v47, %v406_v46 }
 0x1d6   :  { %v425_v50 = vmul.f32 %v413_v48, %v395_v4  ;;  %v424_v54 = vadd.f32 0.5, %v423_v53 }
 0x1d8   :  { %v427_v51 = vadd.f32 %v426_v49, %v425_v50 }
 0x1da   :  { %753 = vtanh.f32 %v427_v51 }
 0x1e7   :  { %v754_v55 = vpop.eup %753 }
 0x1e8   :  { %v429_v56 = vmul.f32 %v754_v55, %v424_v54 }
 0x1ea   :  { %v430_v57 = vmul.f32 2.0, %v429_v56  ;;  %v433_v58 = vmul.f32 %v429_v56, %v941_v17  ;;  %v440_v59 = vmul.f32 %v429_v56, %v943_v19  ;;  %v447_v2 = vmul.f32 %v429_v56, %v945_v20 }
 0x1eb   :  { %v451_v13 = vmul.f32 %v429_v56, %v950_v29 }
 0x1ec   :  { %431 = vst [vmem:[#allocation11 + $0x9] sm:$0x1] %v430_v57  ;;  %v434_v62 = vadd.f32 %v433_v58, %v432_v60  ;;  %v441_v63 = vadd.f32 %v440_v59, %v439_v61  ;;  %v448_v12 = vadd.f32 %v447_v2, %v446_v9 }
 0x1ed   :  { %v452_v15 = vadd.f32 %v451_v13, %v450_v14  ;;  %v510_v13 = vld [vmem:[#allocation4 + $0xc] sm:$0x1] }
 0x1ee   :  { %v435_v3 = vmul.f32 0.5, %v434_v62  ;;  %v442_v7 = vmul.f32 0.5, %v441_v63  ;;  %v496_v62 = vld [vmem:[#allocation2 + $0xc] sm:$0x1]  ;;  %v503_v63 = vld [vmem:[#allocation3 + $0xc] sm:$0x1] }
 0x1ef   :  { %v453_v16 = vmul.f32 0.5, %v452_v15 }
 0x1f0   :  { %755 = vtanh.f32 %v435_v3 }
 0x1f1   :  { %757 = vtanh.f32 %v442_v7 }
 0x1f2   :  { %759 = vtanh.f32 %v448_v12 }
 0x1f3   :  { %761 = vtanh.f32 %v453_v16  ;;  %v514_v16 = vld [vmem:[#allocation5 + $0xc] sm:$0x1] }
 0x1fd   :  { %v756_v18 = vpop.eup %755 }
 0x1fe   :  { %v758_v21 = vpop.eup %757  ;;  %v437_v22 = vmul.f32 0.5, %v756_v18 }
 0x1ff   :  { %v444_v23 = vmul.f32 0.5, %v758_v21  ;;  %v760_v0 = vpop.eup %759 }
 0x200   :  { %v438_v24 = vadd.f32 0.5, %v437_v22  ;;  %v762_v10 = vpop.eup %761 }
 0x201   :  { %v445_v25 = vadd.f32 0.5, %v444_v23  ;;  %v455_v1 = vmul.f32 0.5, %v762_v10 }
 0x202   :  { %v458_v4 = vmul.f32 %v760_v0, %v438_v24 }
 0x203   :  { %v457_v26 = vmul.f32 %v445_v25, %v427_v51  ;;  %v456_v27 = vadd.f32 0.5, %v455_v1 }
 0x205   :  { %v459_v6 = vadd.f32 %v458_v4, %v457_v26 }
 0x207   :  { %763 = vtanh.f32 %v459_v6 }
 0x214   :  { %v764_v5 = vpop.eup %763 }
 0x215   :  { %v461_v8 = vmul.f32 %v764_v5, %v456_v27 }
 0x217   :  { %v462_v28 = vmul.f32 2.0, %v461_v8  ;;  %v465_v11 = vmul.f32 %v461_v8, %v941_v17  ;;  %v472_v30 = vmul.f32 %v461_v8, %v943_v19  ;;  %v479_v35 = vmul.f32 %v461_v8, %v945_v20 }
 0x218   :  { %v483_v40 = vmul.f32 %v461_v8, %v950_v29 }
 0x219   :  { %463 = vst [vmem:[#allocation11 + $0xa] sm:$0x1] %v462_v28  ;;  %v466_v33 = vadd.f32 %v465_v11, %v464_v31  ;;  %v473_v34 = vadd.f32 %v472_v30, %v471_v32  ;;  %v480_v39 = vadd.f32 %v479_v35, %v478_v38 }
 0x21a   :  { %v484_v42 = vadd.f32 %v483_v40, %v482_v41  ;;  %v542_v40 = vld [vmem:[#allocation4 + $0xd] sm:$0x1] }
 0x21b   :  { %v467_v36 = vmul.f32 0.5, %v466_v33  ;;  %v474_v37 = vmul.f32 0.5, %v473_v34  ;;  %v528_v33 = vld [vmem:[#allocation2 + $0xd] sm:$0x1]  ;;  %v535_v34 = vld [vmem:[#allocation3 + $0xd] sm:$0x1] }
 0x21c   :  { %v485_v43 = vmul.f32 0.5, %v484_v42 }
 0x21d   :  { %765 = vtanh.f32 %v467_v36 }
 0x21e   :  { %767 = vtanh.f32 %v474_v37 }
 0x21f   :  { %769 = vtanh.f32 %v480_v39 }
 0x220   :  { %771 = vtanh.f32 %v485_v43  ;;  %v546_v43 = vld [vmem:[#allocation5 + $0xd] sm:$0x1] }
 0x22a   :  { %v766_v44 = vpop.eup %765 }
 0x22b   :  { %v768_v45 = vpop.eup %767  ;;  %v469_v46 = vmul.f32 0.5, %v766_v44 }
 0x22c   :  { %v476_v47 = vmul.f32 0.5, %v768_v45  ;;  %v770_v49 = vpop.eup %769 }
 0x22d   :  { %v470_v48 = vadd.f32 0.5, %v469_v46  ;;  %v772_v54 = vpop.eup %771 }
 0x22e   :  { %v477_v50 = vadd.f32 0.5, %v476_v47  ;;  %v487_v55 = vmul.f32 0.5, %v772_v54 }
 0x22f   :  { %v490_v51 = vmul.f32 %v770_v49, %v470_v48 }
 0x230   :  { %v489_v52 = vmul.f32 %v477_v50, %v459_v6  ;;  %v488_v56 = vadd.f32 0.5, %v487_v55 }
 0x232   :  { %v491_v53 = vadd.f32 %v490_v51, %v489_v52 }
 0x234   :  { %773 = vtanh.f32 %v491_v53 }
 0x241   :  { %v774_v57 = vpop.eup %773 }
 0x242   :  { %v493_v58 = vmul.f32 %v774_v57, %v488_v56 }
 0x244   :  { %v494_v59 = vmul.f32 2.0, %v493_v58  ;;  %v497_v60 = vmul.f32 %v493_v58, %v941_v17  ;;  %v504_v61 = vmul.f32 %v493_v58, %v943_v19  ;;  %v511_v7 = vmul.f32 %v493_v58, %v945_v20 }
 0x245   :  { %v515_v15 = vmul.f32 %v493_v58, %v950_v29  ;;  %v815_v58 = vld [vmem:[#allocation9 + $0x4] sm:$0x1] }
 0x246   :  { %495 = vst [vmem:[#allocation11 + $0xb] sm:$0x1] %v494_v59  ;;  %v498_v2 = vadd.f32 %v497_v60, %v496_v62  ;;  %v505_v3 = vadd.f32 %v504_v61, %v503_v63  ;;  %v512_v14 = vadd.f32 %v511_v7, %v510_v13  ;;  %v816_v60 = vld [vmem:[#allocation9 + $0x5] sm:$0x1]  ;;  %v560_v62 = vld [vmem:[#allocation2 + $0xe] sm:$0x1] }
 0x247   :  { %v516_v18 = vadd.f32 %v515_v15, %v514_v16  ;;  %v567_v63 = vld [vmem:[#allocation3 + $0xe] sm:$0x1]  ;;  %v817_v7 = vld [vmem:[#allocation9 + $0x6] sm:$0x1]  ;;  %v818_v16 = vld [vmem:[#allocation9 + $0x7] sm:$0x1] }
 0x248   :  { %v499_v9 = vmul.f32 0.5, %v498_v2  ;;  %v506_v12 = vmul.f32 0.5, %v505_v3 }
 0x249   :  { %v517_v21 = vmul.f32 0.5, %v516_v18 }
 0x24a   :  { %775 = vtanh.f32 %v499_v9 }
 0x24b   :  { %777 = vtanh.f32 %v506_v12 }
 0x24c   :  { %779 = vtanh.f32 %v512_v14  ;;  %v574_v14 = vld [vmem:[#allocation4 + $0xe] sm:$0x1] }
 0x24d   :  { %781 = vtanh.f32 %v517_v21  ;;  %v578_v21 = vld [vmem:[#allocation5 + $0xe] sm:$0x1] }
 0x257   :  { %v776_v22 = vpop.eup %775 }
 0x258   :  { %v778_v23 = vpop.eup %777  ;;  %v501_v24 = vmul.f32 0.5, %v776_v22 }
 0x259   :  { %v508_v0 = vmul.f32 0.5, %v778_v23  ;;  %v780_v4 = vpop.eup %779 }
 0x25a   :  { %v502_v25 = vadd.f32 0.5, %v501_v24  ;;  %v782_v27 = vpop.eup %781 }
 0x25b   :  { %v509_v26 = vadd.f32 0.5, %v508_v0  ;;  %v519_v5 = vmul.f32 0.5, %v782_v27 }
 0x25c   :  { %v522_v6 = vmul.f32 %v780_v4, %v502_v25 }
 0x25d   :  { %v521_v10 = vmul.f32 %v509_v26, %v491_v53  ;;  %v520_v8 = vadd.f32 0.5, %v519_v5 }
 0x25f   :  { %v523_v1 = vadd.f32 %v522_v6, %v521_v10 }
 0x261   :  { %783 = vtanh.f32 %v523_v1 }
 0x26e   :  { %v784_v28 = vpop.eup %783 }
 0x26f   :  { %v525_v11 = vmul.f32 %v784_v28, %v520_v8 }
 0x271   :  { %v526_v30 = vmul.f32 2.0, %v525_v11  ;;  %v529_v31 = vmul.f32 %v525_v11, %v941_v17  ;;  %v536_v32 = vmul.f32 %v525_v11, %v943_v19  ;;  %v543_v37 = vmul.f32 %v525_v11, %v945_v20 }
 0x272   :  { %v547_v42 = vmul.f32 %v525_v11, %v950_v29 }
 0x273   :  { %527 = vst [vmem:[#allocation11 + $0xc] sm:$0x1] %v526_v30  ;;  %v530_v35 = vadd.f32 %v529_v31, %v528_v33  ;;  %v537_v36 = vadd.f32 %v536_v32, %v535_v34  ;;  %v544_v41 = vadd.f32 %v543_v37, %v542_v40 }
 0x274   :  { %v548_v17 = vadd.f32 %v547_v42, %v546_v43  ;;  %v606_v42 = vld [vmem:[#allocation4 + $0xf] sm:$0x1] }
 0x275   :  { %v531_v38 = vmul.f32 0.5, %v530_v35  ;;  %v538_v39 = vmul.f32 0.5, %v537_v36  ;;  %v592_v35 = vld [vmem:[#allocation2 + $0xf] sm:$0x1]  ;;  %v599_v36 = vld [vmem:[#allocation3 + $0xf] sm:$0x1] }
 0x276   :  { %v549_v44 = vmul.f32 0.5, %v548_v17 }
 0x277   :  { %785 = vtanh.f32 %v531_v38 }
 0x278   :  { %787 = vtanh.f32 %v538_v39 }
 0x279   :  { %789 = vtanh.f32 %v544_v41 }
 0x27a   :  { %791 = vtanh.f32 %v549_v44  ;;  %v610_v44 = vld [vmem:[#allocation5 + $0xf] sm:$0x1] }
 0x284   :  { %v786_v19 = vpop.eup %785 }
 0x285   :  { %v788_v45 = vpop.eup %787  ;;  %v533_v46 = vmul.f32 0.5, %v786_v19 }
 0x286   :  { %v540_v47 = vmul.f32 0.5, %v788_v45  ;;  %v790_v49 = vpop.eup %789 }
 0x287   :  { %v534_v48 = vadd.f32 0.5, %v533_v46  ;;  %v792_v53 = vpop.eup %791 }
 0x288   :  { %v541_v20 = vadd.f32 0.5, %v540_v47  ;;  %v551_v54 = vmul.f32 0.5, %v792_v53 }
 0x289   :  { %v554_v50 = vmul.f32 %v790_v49, %v534_v48 }
 0x28a   :  { %v553_v51 = vmul.f32 %v541_v20, %v523_v1  ;;  %v552_v55 = vadd.f32 0.5, %v551_v54 }
 0x28c   :  { %v555_v52 = vadd.f32 %v554_v50, %v553_v51 }
 0x28e   :  { %793 = vtanh.f32 %v555_v52 }
 0x29b   :  { %v794_v29 = vpop.eup %793 }
 0x29c   :  { %v557_v56 = vmul.f32 %v794_v29, %v552_v55 }
 0x29e   :  { %v558_v57 = vmul.f32 2.0, %v557_v56  ;;  %v561_v59 = vmul.f32 %v815_v58, %v557_v56  ;;  %v568_v61 = vmul.f32 %v816_v60, %v557_v56  ;;  %v575_v9 = vmul.f32 %v817_v7, %v557_v56 }
 0x29f   :  { %v579_v18 = vmul.f32 %v818_v16, %v557_v56 }
 0x2a0   :  { %559 = vst [vmem:[#allocation11 + $0xd] sm:$0x1] %v558_v57  ;;  %v562_v2 = vadd.f32 %v561_v59, %v560_v62  ;;  %v569_v3 = vadd.f32 %v568_v61, %v567_v63  ;;  %v576_v15 = vadd.f32 %v575_v9, %v574_v14 }
 0x2a1   :  { %v580_v22 = vadd.f32 %v579_v18, %v578_v21 }
 0x2a2   :  { %v563_v12 = vmul.f32 0.5, %v562_v2  ;;  %v570_v13 = vmul.f32 0.5, %v569_v3 }
 0x2a3   :  { %v581_v23 = vmul.f32 0.5, %v580_v22 }
 0x2a4   :  { %795 = vtanh.f32 %v563_v12 }
 0x2a5   :  { %797 = vtanh.f32 %v570_v13 }
 0x2a6   :  { %799 = vtanh.f32 %v576_v15 }
 0x2a7   :  { %801 = vtanh.f32 %v581_v23 }
 0x2b1   :  { %v796_v24 = vpop.eup %795 }
 0x2b2   :  { %v798_v0 = vpop.eup %797  ;;  %v565_v25 = vmul.f32 0.5, %v796_v24 }
 0x2b3   :  { %v572_v4 = vmul.f32 0.5, %v798_v0  ;;  %v800_v6 = vpop.eup %799 }
 0x2b4   :  { %v566_v26 = vadd.f32 0.5, %v565_v25  ;;  %v802_v8 = vpop.eup %801 }
 0x2b5   :  { %v573_v10 = vadd.f32 0.5, %v572_v4  ;;  %v583_v28 = vmul.f32 0.5, %v802_v8 }
 0x2b6   :  { %v586_v1 = vmul.f32 %v800_v6, %v566_v26 }
 0x2b7   :  { %v585_v27 = vmul.f32 %v573_v10, %v555_v52  ;;  %v584_v11 = vadd.f32 0.5, %v583_v28 }
 0x2b9   :  { %v587_v5 = vadd.f32 %v586_v1, %v585_v27 }
 0x2bb   :  { %803 = vtanh.f32 %v587_v5 }
 0x2c8   :  { %v804_v30 = vpop.eup %803 }
 0x2c9   :  { %v589_v31 = vmul.f32 %v804_v30, %v584_v11 }
 0x2cb   :  { %v590_v32 = vmul.f32 2.0, %v589_v31  ;;  %v593_v33 = vmul.f32 %v815_v58, %v589_v31  ;;  %v600_v34 = vmul.f32 %v816_v60, %v589_v31  ;;  %v607_v37 = vmul.f32 %v817_v7, %v589_v31 }
 0x2cc   :  { %v611_v17 = vmul.f32 %v818_v16, %v589_v31 }
 0x2cd   :  { %591 = vst [vmem:[#allocation11 + $0xe] sm:$0x1] %v590_v32  ;;  %v594_v38 = vadd.f32 %v593_v33, %v592_v35  ;;  %v601_v39 = vadd.f32 %v600_v34, %v599_v36  ;;  %v608_v43 = vadd.f32 %v607_v37, %v606_v42 }
 0x2ce   :  { %v612_v19 = vadd.f32 %v611_v17, %v610_v44 }
 0x2cf   :  { %v595_v40 = vmul.f32 0.5, %v594_v38  ;;  %v602_v41 = vmul.f32 0.5, %v601_v39 }
 0x2d0   :  { %v613_v45 = vmul.f32 0.5, %v612_v19 }
 0x2d1   :  { %805 = vtanh.f32 %v595_v40 }
 0x2d2   :  { %807 = vtanh.f32 %v602_v41 }
 0x2d3   :  { %809 = vtanh.f32 %v608_v43 }
 0x2d4   :  { %811 = vtanh.f32 %v613_v45 }
 0x2de   :  { %v806_v46 = vpop.eup %805 }
 0x2df   :  { %v808_v47 = vpop.eup %807  ;;  %v597_v48 = vmul.f32 0.5, %v806_v46 }
 0x2e0   :  { %v604_v49 = vmul.f32 0.5, %v808_v47  ;;  %v810_v50 = vpop.eup %809 }
 0x2e1   :  { %v598_v20 = vadd.f32 0.5, %v597_v48  ;;  %v812_v55 = vpop.eup %811 }
 0x2e2   :  { %v605_v51 = vadd.f32 0.5, %v604_v49  ;;  %v615_v29 = vmul.f32 0.5, %v812_v55 }
 0x2e3   :  { %v618_v52 = vmul.f32 %v810_v50, %v598_v20 }
 0x2e4   :  { %v617_v53 = vmul.f32 %v605_v51, %v587_v5  ;;  %v616_v56 = vadd.f32 0.5, %v615_v29 }
 0x2e6   :  { %v619_v54 = vadd.f32 %v618_v52, %v617_v53 }
 0x2e8   :  { %813 = vtanh.f32 %v619_v54 }
 0x2f5   :  { %v814_v57 = vpop.eup %813 }
 0x2f6   :  { %v621_v58 = vmul.f32 %v814_v57, %v616_v56 }
 0x2f8   :  { %v622_v59 = vmul.f32 2.0, %v621_v58 }
 0x2fa   :  { %623 = vst [vmem:[#allocation11 + $0xf] sm:$0x1] %v622_v59 }
 0x2fb   :  { %870 = shalt.err (!%p867_p0)
}
 0x2fc   :  { %635 = dma.vmem_to_hbm [thread:$0]  %s630_s1, 256, %s1021_s2, [#allocation8], %s886_s12, %s886_s12, %s887_s13  }
 0x2fd   :  { %883 = dma.done.wait [#allocation8], 256  }
 0x2fe   :  { %884 = vsyncadd [#allocation8], 4294967040 }
 0x2ff   :  { %639 = vsyncpa [#allocation7], 1 }
 0x300   :  { %640 = vsyncpa [#allocation10], 1 }
 0x301   :  { %641 = vsyncpa [#allocation8], 1 }

</bundles_post_ra>
